<compile_context>
chip_gen: v5e
topology: v5e:2x2
jax: 0.10.0
libtpu: 0.0.40
codegen_flags: <defaults>
</compile_context>

<pallas_src>
import functools

import jax
import jax.numpy as jnp
from jax.experimental import pallas as pl
from jax.experimental.pallas import tpu as pltpu


# ---------------------------------------------------------------------------
# Kernels
# ---------------------------------------------------------------------------

def _make_resident_kernel(n_chunks, h_chunk):
    """Weights fully VMEM-resident; no accumulator scratch.

    Iterates the hidden dim in `h_chunk`-wide slices of the resident weight
    refs so the f32 intermediate stays (tile_m, h_chunk) instead of
    (tile_m, H)."""

    def kernel(x_ref, w1_ref, b1_ref, w2_ref, b2_ref, o_ref):
        x = x_ref[...]                                   # native dtype
        acc = jnp.zeros((x.shape[0], o_ref.shape[-1]), jnp.float32)
        for c in range(n_chunks):                        # static unroll
            sl = pl.ds(c * h_chunk, h_chunk)
            h = jnp.dot(x, w1_ref[:, sl], preferred_element_type=jnp.float32)
            h = jnp.maximum(h + b1_ref[:, sl].astype(jnp.float32), 0.0)
            # Cast back to the input dtype so bf16 stays on the fast MXU path
            # (no-op for f32); accumulate in f32.
            acc = acc + jnp.dot(h.astype(x.dtype), w2_ref[sl, :],
                                preferred_element_type=jnp.float32)
        o_ref[...] = (acc + b2_ref[...].astype(jnp.float32)).astype(o_ref.dtype)

    return kernel


def _streaming_kernel(x_ref, w1_ref, b1_ref, w2_ref, b2_ref, o_ref, acc_ref):
    """Weights streamed in H tiles over grid axis 1 ("arbitrary")."""
    hi = pl.program_id(1)

    @pl.when(hi == 0)
    def _():
        acc_ref[...] = jnp.zeros_like(acc_ref)

    h = jnp.dot(x_ref[...], w1_ref[...], preferred_element_type=jnp.float32)
    h = jnp.maximum(h + b1_ref[...].astype(jnp.float32), 0.0)
    acc_ref[...] += jnp.dot(h.astype(x_ref.dtype), w2_ref[...],
                            preferred_element_type=jnp.float32)

    @pl.when(hi == pl.num_programs(1) - 1)
    def _():
        o_ref[...] = (acc_ref[...] + b2_ref[...].astype(jnp.float32)
                      ).astype(o_ref.dtype)


# ---------------------------------------------------------------------------
# Planning helpers
# ---------------------------------------------------------------------------

def _round_up(a, b):
    return -(-a // b) * b


def _round_down(a, b):
    return (a // b) * b


def _vmem_capacity_bytes():
    try:
        return int(pltpu.get_tpu_info().vmem_capacity_bytes)
    except Exception:                       # pragma: no cover - defensive
        return 64 << 20                     # conservative: assume v7x VMEM


def _plan(M, E, H, itemsize, tile_m, tile_h):
    """Pick row tile, hidden tiling strategy and VMEM limit.

    Returns (tile_m, tile_h, resident, h_chunk, num_m, num_h, vmem_limit)."""
    sub = max(8, 32 // itemsize)            # sublane multiple: 8/16/32
    cap = _vmem_capacity_bytes()
    budget = (cap * 13) // 16               # ~52 MiB v7x, ~104 MiB v5e/v6e
    margin = 4 << 20

    weight_bytes = (2 * E * H + H + E) * itemsize   # one copy of both layers

    # Resident iff two pipeline copies of the weights fit in ~half the budget
    # (~13 MiB threshold on v7x, 24 MiB on v5e/v6e).
    resident_thr = min(24 << 20, budget // 4)
    if tile_h is not None:
        resident = tile_h >= H
    else:
        resident = weight_bytes <= resident_thr

    if resident:
        th = H
        # Bound the f32 intermediate: chunk H inside the kernel (weights stay
        # resident, so no extra HBM traffic).
        h_chunk = 512 if (H % 512 == 0 and H > 512) else H
        fixed = 2 * weight_bytes + margin                 # 2 pipeline buffers
        # per-row bytes: x (x2 bufs) + out (x2 bufs) + h f32 + h cast copy
        per_row = 4 * E * itemsize + h_chunk * (4 + itemsize)
        tm_default = 512 if itemsize <= 2 else 256
    else:
        if tile_h is not None:
            th = tile_h
        else:
            th = H
            # Keep K (= tile_h) a multiple of 256 (full MXU width on v6e/v7x)
            # with a 512 floor; shrink until weight tiles use <= half budget.
            def wtile_bytes(t):
                return 3 * (2 * E * t + t) * itemsize     # Buffered(3)
            while (th > 512 and th % 2 == 0 and (th // 2) % 256 == 0
                   and wtile_bytes(th) > budget // 2):
                th //= 2
        assert H % th == 0, "tile_h must divide the hidden dim"
        h_chunk = th
        fixed = 3 * (2 * E * th + th) * itemsize + 2 * E * itemsize + margin
        # per-row: x/out double buffers + f32 acc scratch + h f32 + h cast copy
        per_row = 4 * E * itemsize + 4 * E + th * (4 + itemsize)
        # Streamed weights are re-read once per row tile -> big row tiles.
        tm_default = 1024

    avail = budget - fixed
    if avail >= per_row * sub:
        tm_budget = _round_down(avail // per_row, sub)
    else:
        tm_budget = sub
    tm = tile_m if tile_m is not None else min(tm_default, tm_budget)
    tm = max(sub, _round_up(min(tm, _round_up(M, sub)), sub))

    if tile_m is None and M > sub:
        # >= 2 row tiles so both v7x TensorCores get work ...
        tm = min(tm, _round_up(-(-M // 2), sub))
        num_m = -(-M // tm)
        # ... and prefer an even tile count for a balanced megacore split.
        if num_m > 1 and num_m % 2 == 1:
            tm_even = max(sub, _round_up(-(-M // (num_m + 1)), sub))
            if -(-M // tm_even) % 2 == 0:
                tm = tm_even

    num_m = -(-M // tm)
    num_h = 1 if resident else H // th

    need = (fixed - margin) + per_row * tm
    vmem_limit = int(min(budget, max(need + margin, 32 << 20)))
    return tm, th, resident, h_chunk, num_m, num_h, vmem_limit


# ---------------------------------------------------------------------------
# Public forward
# ---------------------------------------------------------------------------

@functools.partial(jax.jit, static_argnames=("tile_m", "tile_h"))
def ffn_forward(x, w1, b1, w2, b2, *, tile_m=None, tile_h=None):
    """x: (B, T, E) -> (B, T, E).  Weights stored (in, out): y = x @ W + b."""
    B, T, E = x.shape
    H = w1.shape[1]
    M = B * T
    itemsize = jnp.dtype(x.dtype).itemsize

    tm, th, resident, h_chunk, num_m, num_h, vmem_limit = _plan(
        M, E, H, itemsize, tile_m, tile_h)

    xf = x.reshape(M, E)
    weight_reads = 1 if resident else num_m   # streamed weights re-read per row tile
    cost = pl.CostEstimate(
        flops=4 * M * E * H,
        transcendentals=0,
        bytes_accessed=(2 * M * E + weight_reads * (2 * E * H + H + E)) * itemsize)

    if resident:
        kernel = _make_resident_kernel(H // h_chunk, h_chunk)
        grid_spec = pltpu.PrefetchScalarGridSpec(
            num_scalar_prefetch=0,
            grid=(num_m,),
            in_specs=[
                pl.BlockSpec((tm, E), lambda i: (i, 0)),   # x row tile
                # Constant index_map -> weights DMA'd once, stay VMEM-resident.
                pl.BlockSpec((E, H), lambda i: (0, 0)),    # w1
                pl.BlockSpec((1, H), lambda i: (0, 0)),    # b1
                pl.BlockSpec((H, E), lambda i: (0, 0)),    # w2
                pl.BlockSpec((1, E), lambda i: (0, 0)),    # b2
            ],
            out_specs=pl.BlockSpec((tm, E), lambda i: (i, 0)),
        )
        dims = ("parallel",)
    else:
        kernel = _streaming_kernel
        wmode = pl.Buffered(3)   # deeper buffering hides the big weight DMAs
        grid_spec = pltpu.PrefetchScalarGridSpec(
            num_scalar_prefetch=0,
            grid=(num_m, num_h),
            in_specs=[
                pl.BlockSpec((tm, E), lambda i, h: (i, 0)),                      # x
                pl.BlockSpec((E, th), lambda i, h: (0, h), pipeline_mode=wmode),  # w1
                pl.BlockSpec((1, th), lambda i, h: (0, h)),                      # b1
                pl.BlockSpec((th, E), lambda i, h: (h, 0), pipeline_mode=wmode),  # w2
                pl.BlockSpec((1, E), lambda i, h: (0, 0)),                       # b2
            ],
            out_specs=pl.BlockSpec((tm, E), lambda i, h: (i, 0)),
            scratch_shapes=[pltpu.VMEM((tm, E), jnp.float32)],
        )
        dims = ("parallel", "arbitrary")

    out = pl.pallas_call(
        kernel,
        out_shape=jax.ShapeDtypeStruct((M, E), x.dtype),
        grid_spec=grid_spec,
        compiler_params=pltpu.CompilerParams(
            dimension_semantics=dims,
            vmem_limit_bytes=vmem_limit),
        cost_estimate=cost,
    )(xf, w1, b1, w2, b2)
    return out.reshape(B, T, E)


def init_ffn_params(key, embedding_dim, dtype=jnp.float32):
    """nn.Linear-style init (uniform +-1/sqrt(fan_in)); weights stored (in, out)."""
    E = embedding_dim
    H = 4 * E
    k1, k2, k3, k4 = jax.random.split(key, 4)
    bound1 = 1.0 / (E ** 0.5)
    bound2 = 1.0 / (H ** 0.5)
    w1 = jax.random.uniform(k1, (E, H), dtype, minval=-bound1, maxval=bound1)
    b1 = jax.random.uniform(k2, (1, H), dtype, minval=-bound1, maxval=bound1)
    w2 = jax.random.uniform(k3, (H, E), dtype, minval=-bound2, maxval=bound2)
    b2 = jax.random.uniform(k4, (1, E), dtype, minval=-bound2, maxval=bound2)
    return w1, b1, w2, b2


if __name__ == "__main__":
    # Small but lane-dense: E = 128 (multiple of 128) -> H = 512.
    # M = B*T = 512 rows -> tile_m = 256, grid = (2,): resident weights,
    # two parallel row tiles (both v7x TensorCores get work).
    B, T, E = 2, 256, 128
    key = jax.random.PRNGKey(0)
    kx, kp = jax.random.split(key)
    x = jax.random.normal(kx, (B, T, E), jnp.float32)
    w1, b1, w2, b2 = init_ffn_params(kp, E, jnp.float32)

    y = ffn_forward(x, w1, b1, w2, b2)
    jax.block_until_ready(y)

    # Pure-JAX reference (same math as the PyTorch module).
    ref = jnp.maximum(
        jnp.dot(x.reshape(-1, E), w1, precision="highest") + b1, 0.0)
    ref = (jnp.dot(ref, w2, precision="highest") + b2).reshape(B, T, E)

    assert y.shape == (B, T, E)
    assert jnp.allclose(y, ref, atol=2e-3, rtol=2e-3), \
        float(jnp.max(jnp.abs(y - ref)))

    # bf16 fast path: post-ReLU activations are downcast before the second
    # matmul, so compare against the f32 reference with a wide tolerance.
    xb = x.astype(jnp.bfloat16)
    w1b, b1b, w2b, b2b = (p.astype(jnp.bfloat16) for p in (w1, b1, w2, b2))
    yb = ffn_forward(xb, w1b, b1b, w2b, b2b)
    jax.block_until_ready(yb)
    assert yb.shape == (B, T, E)
    assert jnp.allclose(yb.astype(jnp.float32), ref, atol=0.1, rtol=0.1), \
        float(jnp.max(jnp.abs(yb.astype(jnp.float32) - ref)))

    print("KERNEL_OK")
</pallas_src>

<mosaic_0001>
module attributes {stable_mosaic.version = 11 : i64} {
  func.func @kernel(%arg0: i32, %arg1: memref<256x128xf32, #tpu.memory_space<vmem>>, %arg2: memref<128x512xf32, #tpu.memory_space<vmem>>, %arg3: memref<1x512xf32, #tpu.memory_space<vmem>>, %arg4: memref<512x128xf32, #tpu.memory_space<vmem>>, %arg5: memref<1x128xf32, #tpu.memory_space<vmem>>, %arg6: memref<256x128xf32, #tpu.memory_space<vmem>>) attributes {dimension_semantics = [#tpu.dimension_semantics<parallel>], iteration_bounds = array<i64: 2>, scalar_prefetch = 0 : i64, scratch_operands = 0 : i64, tpu.core_type = #tpu.core_type<tc>, window_params = [{transform_indices = @transform_0, window_bounds = array<i64: 256, 128>}, {pipeline_mode = #tpu.pipeline_mode<synchronous>, transform_indices = @transform_1, window_bounds = array<i64: 128, 512>}, {pipeline_mode = #tpu.pipeline_mode<synchronous>, transform_indices = @transform_2, window_bounds = array<i64: 1, 512>}, {pipeline_mode = #tpu.pipeline_mode<synchronous>, transform_indices = @transform_3, window_bounds = array<i64: 512, 128>}, {pipeline_mode = #tpu.pipeline_mode<synchronous>, transform_indices = @transform_4, window_bounds = array<i64: 1, 128>}, {transform_indices = @transform_5, window_bounds = array<i64: 256, 128>}]} {
    %c0 = arith.constant 0 : index
    %c0_0 = arith.constant 0 : index
    %0 = vector.load %arg1[%c0, %c0_0] : memref<256x128xf32, #tpu.memory_space<vmem>>, vector<256x128xf32>
    %cst = arith.constant 0.000000e+00 : f32
    %1 = vector.broadcast %cst : f32 to vector<256x128xf32>
    %c0_1 = arith.constant 0 : index
    %c0_2 = arith.constant 0 : index
    %2 = vector.load %arg2[%c0_1, %c0_2] : memref<128x512xf32, #tpu.memory_space<vmem>>, vector<128x512xf32>
    %cst_3 = arith.constant dense<0.000000e+00> : vector<256x512xf32>
    %3 = tpu.matmul %0, %2, %cst_3 {dimension_numbers = #tpu.dot_dimension_numbers<[1], [0], [0], [1], [0, 0, 1, 1], [], []>} : vector<256x128xf32>, vector<128x512xf32>, vector<256x512xf32> -> vector<256x512xf32>
    %c0_4 = arith.constant 0 : index
    %c0_5 = arith.constant 0 : index
    %4 = vector.load %arg3[%c0_4, %c0_5] : memref<1x512xf32, #tpu.memory_space<vmem>>, vector<1x512xf32>
    %5 = vector.broadcast %4 : vector<1x512xf32> to vector<256x512xf32>
    %6 = arith.addf %3, %5 : vector<256x512xf32>
    %cst_6 = arith.constant 0.000000e+00 : f32
    %7 = vector.broadcast %cst_6 : f32 to vector<256x512xf32>
    %8 = arith.maximumf %6, %7 : vector<256x512xf32>
    %c0_7 = arith.constant 0 : index
    %c0_8 = arith.constant 0 : index
    %9 = vector.load %arg4[%c0_7, %c0_8] : memref<512x128xf32, #tpu.memory_space<vmem>>, vector<512x128xf32>
    %cst_9 = arith.constant dense<0.000000e+00> : vector<256x128xf32>
    %10 = tpu.matmul %8, %9, %cst_9 {dimension_numbers = #tpu.dot_dimension_numbers<[1], [0], [0], [1], [0, 0, 1, 1], [], []>} : vector<256x512xf32>, vector<512x128xf32>, vector<256x128xf32> -> vector<256x128xf32>
    %11 = arith.addf %1, %10 : vector<256x128xf32>
    %c0_10 = arith.constant 0 : index
    %c0_11 = arith.constant 0 : index
    %12 = vector.load %arg5[%c0_10, %c0_11] : memref<1x128xf32, #tpu.memory_space<vmem>>, vector<1x128xf32>
    %13 = vector.broadcast %12 : vector<1x128xf32> to vector<256x128xf32>
    %14 = arith.addf %11, %13 : vector<256x128xf32>
    %c0_12 = arith.constant 0 : index
    %c0_13 = arith.constant 0 : index
    %15 = vector.load %arg6[%c0_12, %c0_13] : memref<256x128xf32, #tpu.memory_space<vmem>>, vector<256x128xf32>
    tpu.vector_store %arg6[%c0_12, %c0_13], %14 {strides = array<i32>} : memref<256x128xf32, #tpu.memory_space<vmem>>, vector<256x128xf32>,
    return
  }
  func.func @transform_0(%arg0: i32) -> (i32, i32) {
    %c0_i32 = arith.constant 0 : i32
    %c0_i32_0 = arith.constant 0 : i32
    return %arg0, %c0_i32 : i32, i32
  }
  func.func @transform_1(%arg0: i32) -> (i32, i32) {
    %c0_i32 = arith.constant 0 : i32
    %c0_i32_0 = arith.constant 0 : i32
    %c0_i32_1 = arith.constant 0 : i32
    return %c0_i32, %c0_i32_0 : i32, i32
  }
  func.func @transform_2(%arg0: i32) -> (i32, i32) {
    %c0_i32 = arith.constant 0 : i32
    %c0_i32_0 = arith.constant 0 : i32
    %c0_i32_1 = arith.constant 0 : i32
    return %c0_i32, %c0_i32_0 : i32, i32
  }
  func.func @transform_3(%arg0: i32) -> (i32, i32) {
    %c0_i32 = arith.constant 0 : i32
    %c0_i32_0 = arith.constant 0 : i32
    %c0_i32_1 = arith.constant 0 : i32
    return %c0_i32, %c0_i32_0 : i32, i32
  }
  func.func @transform_4(%arg0: i32) -> (i32, i32) {
    %c0_i32 = arith.constant 0 : i32
    %c0_i32_0 = arith.constant 0 : i32
    %c0_i32_1 = arith.constant 0 : i32
    return %c0_i32, %c0_i32_0 : i32, i32
  }
  func.func @transform_5(%arg0: i32) -> (i32, i32) {
    %c0_i32 = arith.constant 0 : i32
    %c0_i32_0 = arith.constant 0 : i32
    return %arg0, %c0_i32 : i32, i32
  }
}

</mosaic_0001>

<bundles_post_ra>
// kernel: ffn_forward.1
= control target key start
LH: loop header
LB: loop body
LE: loop exit
PB: predicated region body
PF: predicated region fallthrough
CT: control target
= control target key end

     0   :  { %10 = vsyncpa [#allocation3], 0  ;;  %s2786_s0 = inlined_call_operand.hbm [shape: f32[512,128], index: 0, kind: input, shape index: {}]   ;;  %s2787_s1 = inlined_call_operand.hbm [shape: f32[128,512], index: 1, kind: input, shape index: {}]   ;;  %s2788_s2 = inlined_call_operand.hbm [shape: f32[1,512], index: 2, kind: input, shape index: {}]   ;;  %s2789_s3 = inlined_call_operand.hbm [shape: f32[512,128], index: 3, kind: input, shape index: {}]   ;;  %s2790_s4 = inlined_call_operand.vmem [shape: f32[1,128], index: 4, kind: input, shape index: {}]   ;;  %s2791_s5 = inlined_call_operand.hbm [shape: f32[512,128], index: 5, kind: output, shape index: {}]  }
   0x1   :  { %12 = vsyncpa [#allocation3 + $0x1], 0 }
   0x2   :  { %13 = vsyncpa [#allocation6], 0 }
   0x3   :  { %14 = vsyncpa [#allocation9], 0 }
   0x4   :  { %15 = vsyncpa [#allocation4], 0 }
   0x5   :  { %17 = vsyncpa [#allocation4 + $0x1], 0  ;;  %s1992_s18 = smov 0   ;;  %s1994_s19 = smov 0  }
   0x6   :  { %s1996_s20 = smov 0   ;;  %s1998_s21 = smov 0  }
   0x7 LB: > { %s2013_s22 = sadd.s32 4294967295, %s1951_s21   ;;  %s1651_s23 = sadd.s32 4294967294, %s1951_s21   ;;  %s1951_s21 = sphi %s1998_s21, %s2866_s21   ;;  %s1947_s20 = sphi %s1996_s20, %s2865_s20   ;;  %s1943_s19 = sphi %s1994_s19, %s2864_s19   ;;  %s1939_s18 = sphi %s1992_s18, %s2863_s18  }
   0x8   : > { %p43_p0 = scmp.ne.s32.totalorder %s1943_s19, %s1939_s18  ;;  %p44_p1 = scmp.eq.s32.totalorder %s2013_s22, 0 }
   0x9   : > { %p151_p2 = scmp.eq.s32.totalorder %s2013_s22, 1  ;;  %p157_p3 = scmp.eq.s32.totalorder %s1651_s23, 1 }
   0xa   : > { %p2022_p4 = por %p44_p1, %p43_p0  ;;  %p1652_p5 = scmp.ge.s32.totalorder %s1951_s21, 1 }
   0xb   : > { %p2027_p6 = por %p157_p3, %p43_p0  ;;  %p164_p7 = scmp.lt.s32.totalorder %s1951_s21, 3 }
   0xc   : > { %s175_s28 = sshll.u32 %s2787_s1, 4  ;;  %s1953_s30 = smov [#allocation5]   ;;  %s176_s28 = int_to_ptr.hbm [resolvable:$true] %s175_s28 }
   0xd   : > { %p2035_p8 = pnand %p1652_p5, %p164_p7  ;;  %s177_s6 = sshll.u32 %s1953_s30, 4  ;;  %s178_s6 = int_to_ptr.vmem [resolvable:$true] %s177_s6 }
   0xe   : > { %s190_s10 = sshll.u32 %s2788_s2, 4  ;;  %s1954_s11 = smov 512   ;;  %s191_s10 = int_to_ptr.hbm [resolvable:$true] %s190_s10 }
   0xf   : > { %p1689_p9 = pneg %p2035_p8  ;;  %s1955_s12 = smov 32  }
  0x10   : > { %s1956_s13 = smov [#allocation7]   ;;  %s201_s17 = sshll.u32 %s2789_s3, 4  ;;  %s202_s17 = int_to_ptr.hbm [resolvable:$true] %s201_s17 }
  0x11   : > { %p2043_p10 = pnand %p1689_p9, %p44_p1  ;;  %s192_s14 = sshll.u32 %s1956_s13, 4  ;;  %s193_s14 = int_to_ptr.vmem [resolvable:$true] %s192_s14 }
  0x12   : > { %s1957_s23 = smov [#allocation8]   ;;  %s2792_s27 = smov 128  }
  0x13   : > { %1692 = dma.hbm_to_vmem [thread:$0]  (!%p2043_p10), %s176_s28, 8192, %s178_s6, [#allocation6], %s1954_s11, %s1954_s11, %s1955_s12  }
  0x14   : > { %1695 = dma.hbm_to_vmem [thread:$0]  (!%p2043_p10), %s191_s10, 64, %s193_s14, [#allocation6]  }
  0x15   : > { %s203_s26 = sshll.u32 %s1957_s23, 4  ;;  %s1959_s28 = smov 8   ;;  %s204_s26 = int_to_ptr.vmem [resolvable:$true] %s203_s26 }
  0x16   : > { %1698 = dma.hbm_to_vmem [thread:$0]  (!%p2043_p10), %s202_s17, 8192, %s204_s26, [#allocation9], %s2792_s27, %s2792_s27, %s1959_s28  }
  0x17   : > { %s2064_s30 = sadd.s32 1, %s1951_s21   ;;  %s30_s8 = sadd.s32 1, %s1947_s20 }
  0x18   : > { %s27_s6 = ssub.s32 %s1951_s21, %s2064_s30  ;;  %p37_p13 = scmp.ne.s32.totalorder %s1947_s20, %s1943_s19 }
  0x19   : > { %p28_p12 = scmp.eq.s32.totalorder %s27_s6, 0  ;;  %p38_p0 = scmp.eq.s32.totalorder %s1951_s21, 0 }
  0x1a   : > { %p2077_p3 = por %p151_p2, %p37_p13  ;;  %p1710_p5 = scmp.lt.s32.totalorder %s1951_s21, 2 }
  0x1b   : > { %s2073_s9 = scalar_select %p28_p12, %s1947_s20, %s30_s8  }
  0x1c   : > { %s220_s7 = sand.u32 1, %s1947_s20   ;;  %s1671_s11 = sshll.u32 %s1951_s21, 8 }
  0x1d   : > { %p39_p7 = por %p38_p0, %p37_p13  ;;  %s1657_s12 = sshll.u32 %s220_s7, 8 }
  0x1e   : > { %s229_s15 = scalar_lea.hbm %s2786_s0, %s1671_s11  ;;  %s224_s17 = scalar_lea.vmem [#allocation2], %s1657_s12 }
  0x1f   : > { %s230_s16 = sshll.u32 %s229_s15, 4  ;;  %s232_s23 = sshll.u32 %s224_s17, 4  ;;  %s231_s16 = int_to_ptr.hbm [resolvable:$true] %s230_s16  ;;  %s233_s23 = int_to_ptr.vmem [resolvable:$true] %s232_s23 }
  0x20   : > { %p2087_p9 = pnand %p1710_p5, %p39_p7  ;;  %s221_s6 = scalar_lea.sflag [#allocation3], %s220_s7 }
  0x21   : > { %s1847_s8 = sshra.s32 %s231_s16, 4  ;;  %s1854_s12 = scalar_lea.hbm %s2786_s0, 512  ;;  %s1848_s8 = int_to_ptr.hbm [resolvable:$true] %s1847_s8 }
  0x22   : > { %s1849_s27 = scalar_lea.hbm %s1848_s8, 256  ;;  %p1851_p10 = pneg %p2087_p9 }
  0x23   : > { %p1850_p2 = scmp.ne.s32.totalorder %s1848_s8, %s1849_s27  ;;  %p1855_p0 = scmp.lt.s32.totalorder %s1848_s8, %s2786_s0 }
  0x24   : > { %p1856_p5 = scmp.lt.s32.totalorder %s1854_s12, %s1849_s27 }
  0x25   : > { %p1852_p12 = pnand %p1851_p10, %p1850_p2 }
  0x26   : > { %p1857_p7 = por %p1856_p5, %p1855_p0 }
  0x27   : > { %p1853_p13 = pneg %p1852_p12 }
  0x29   : > { %p1858_p11 = pnand %p1857_p7, %p1853_p13 }
  0x2b   : > { %1861 = shalt.err (!%p1858_p11)
}
  0x2c   : > { %s2799_s7 = smov 128   ;;  %244 = sbr.rel (%p2035_p8) target bundleno = 735 (0x2df), region = 40 }
  0x2d   : > { %1702 = dma.hbm_to_vmem [thread:$0]  (!%p2087_p9), %s231_s16, 4096, %s233_s23, %s221_s6, %s2799_s7, %s2799_s7, %s1959_s28  }
  0x31   : > { %s2107_s17 = sand.u32 1, %s1943_s19  }
  0x32   : > { %s1661_s27 = sshll.u32 %s2107_s17, 8  ;;  %s247_s8 = scalar_lea.sflag [#allocation3], %s2107_s17 }
  0x33   : > { %s2113_s11 = scalar_lea.vmem [#allocation2], %s1661_s27 }
  0x34   : > { %1922 = dma.done.wait (%p2022_p4), %s247_s8, 4096  }
  0x35   : > { %1924 = vsyncadd (%p2022_p4), %s247_s8, 4294963200 }
  0x36   : > { %1926 = dma.done.wait (%p44_p1), [#allocation6], 8256  }
  0x37   : > { %1928 = vsyncadd (%p44_p1), [#allocation6], 4294959040 }
  0x38   : > { %1930 = dma.done.wait (%p44_p1), [#allocation9], 8192  }
  0x39   : > { %1932 = vsyncadd (%p44_p1), [#allocation9], 4294959104  ;;  %v387_v0 = vld [vmem:[#allocation5 + $0x1e0] sm:$0xff]  ;;  %v388_v1 = vld [vmem:[#allocation5 + $0x1e8] sm:$0xff]  ;;  %s2576_s28 = scalar_lea.vmem [#allocation10], %s1661_s27  ;;  %s1672_s16 = sshll.u32 %s2013_s22, 8 }
  0x3a   : > { %v389_v2 = vld [vmem:[#allocation5 + $0x1f0] sm:$0xff]  ;;  %401 = vmatpush.msra.mxu0 %v387_v0  ;;  %514 = vmatpush.msra.mxu1 %v388_v1  ;;  %v390_v3 = vld [vmem:[#allocation5 + $0x1f8] sm:$0xff]  ;;  %v383_v4 = vld [vmem:[#allocation5 + $0x1c0] sm:$0xff]  ;;  %s1545_s6 = scalar_lea.hbm %s2791_s5, %s1672_s16  ;;  %s1546_s13 = sshll.u32 %s2576_s28, 4  ;;  %s1547_s13 = int_to_ptr.vmem [resolvable:$true] %s1546_s13 }
  0x3b   : > { %v384_v5 = vld [vmem:[#allocation5 + $0x1c8] sm:$0xff]  ;;  %627 = vmatpush.msra.mxu2 %v389_v2  ;;  %740 = vmatpush.msra.mxu3 %v390_v3  ;;  %v385_v6 = vld [vmem:[#allocation5 + $0x1d0] sm:$0xff]  ;;  %v386_v7 = vld [vmem:[#allocation5 + $0x1d8] sm:$0xff]  ;;  %s1548_s12 = sshll.u32 %s1545_s6, 4  ;;  %s1534_s22 = scalar_lea.sflag [#allocation4], %s2107_s17  ;;  %s1549_s12 = int_to_ptr.hbm [resolvable:$true] %s1548_s12 }
  0x3c   : > { %v379_v8 = vld [vmem:[#allocation5 + $0x1a0] sm:$0xff]  ;;  %402 = vmatpush.msra.mxu0 %v383_v4  ;;  %515 = vmatpush.msra.mxu1 %v384_v5  ;;  %v380_v9 = vld [vmem:[#allocation5 + $0x1a8] sm:$0xff]  ;;  %v381_v10 = vld [vmem:[#allocation5 + $0x1b0] sm:$0xff]  ;;  %s1891_s14 = sshra.s32 %s1549_s12, 4  ;;  %s1897_s8 = scalar_lea.hbm %s2791_s5, 512  ;;  %s1892_s14 = int_to_ptr.hbm [resolvable:$true] %s1891_s14 }
  0x3d   : > { %v382_v11 = vld [vmem:[#allocation5 + $0x1b8] sm:$0xff]  ;;  %628 = vmatpush.msra.mxu2 %v385_v6  ;;  %741 = vmatpush.msra.mxu3 %v386_v7  ;;  %v375_v12 = vld [vmem:[#allocation5 + $0x180] sm:$0xff]  ;;  %v376_v13 = vld [vmem:[#allocation5 + $0x188] sm:$0xff]  ;;  %s1893_s15 = scalar_lea.hbm %s1892_s14, 256  ;;  %p1898_p11 = scmp.lt.s32.totalorder %s1892_s14, %s2791_s5 }
  0x3e   : > { %403 = vmatpush.msra.mxu0 %v379_v8  ;;  %516 = vmatpush.msra.mxu1 %v380_v9  ;;  %v377_v14 = vld [vmem:[#allocation5 + $0x190] sm:$0xff]  ;;  %v378_v15 = vld [vmem:[#allocation5 + $0x198] sm:$0xff]  ;;  %v371_v16 = vld [vmem:[#allocation5 + $0x160] sm:$0xff]  ;;  %p1894_p1 = scmp.ne.s32.totalorder %s1892_s14, %s1893_s15  ;;  %p1899_p9 = scmp.lt.s32.totalorder %s1897_s8, %s1893_s15 }
  0x3f   : > { %629 = vmatpush.msra.mxu2 %v381_v10  ;;  %742 = vmatpush.msra.mxu3 %v382_v11  ;;  %v372_v17 = vld [vmem:[#allocation5 + $0x168] sm:$0xff]  ;;  %v373_v18 = vld [vmem:[#allocation5 + $0x170] sm:$0xff]  ;;  %v374_v19 = vld [vmem:[#allocation5 + $0x178] sm:$0xff] }
  0x40   : > { %404 = vmatpush.msra.mxu0 %v375_v12  ;;  %517 = vmatpush.msra.mxu1 %v376_v13  ;;  %v367_v20 = vld [vmem:[#allocation5 + $0x140] sm:$0xff]  ;;  %v368_v21 = vld [vmem:[#allocation5 + $0x148] sm:$0xff]  ;;  %v369_v22 = vld [vmem:[#allocation5 + $0x150] sm:$0xff]  ;;  %p1895_p4 = pnand %p1894_p1, %p2077_p3  ;;  %p1900_p2 = por %p1899_p9, %p1898_p11 }
  0x41   : > { %630 = vmatpush.msra.mxu2 %v377_v14  ;;  %743 = vmatpush.msra.mxu3 %v378_v15  ;;  %v370_v23 = vld [vmem:[#allocation5 + $0x158] sm:$0xff]  ;;  %v363_v24 = vld [vmem:[#allocation5 + $0x120] sm:$0xff]  ;;  %v364_v25 = vld [vmem:[#allocation5 + $0x128] sm:$0xff] }
  0x42   : > { %405 = vmatpush.msra.mxu0 %v371_v16  ;;  %518 = vmatpush.msra.mxu1 %v372_v17  ;;  %v365_v26 = vld [vmem:[#allocation5 + $0x130] sm:$0xff]  ;;  %v366_v27 = vld [vmem:[#allocation5 + $0x138] sm:$0xff]  ;;  %v359_v28 = vld [vmem:[#allocation5 + $0x100] sm:$0xff]  ;;  %p1896_p8 = pneg %p1895_p4 }
  0x43   : > { %631 = vmatpush.msra.mxu2 %v373_v18  ;;  %744 = vmatpush.msra.mxu3 %v374_v19  ;;  %v360_v29 = vld [vmem:[#allocation5 + $0x108] sm:$0xff]  ;;  %v361_v30 = vld [vmem:[#allocation5 + $0x110] sm:$0xff]  ;;  %v362_v31 = vld [vmem:[#allocation5 + $0x118] sm:$0xff] }
  0x44   : > { %406 = vmatpush.msra.mxu0 %v367_v20  ;;  %519 = vmatpush.msra.mxu1 %v368_v21  ;;  %v355_v32 = vld [vmem:[#allocation5 + $0xe0] sm:$0xff]  ;;  %v356_v33 = vld [vmem:[#allocation5 + $0xe8] sm:$0xff]  ;;  %v357_v34 = vld [vmem:[#allocation5 + $0xf0] sm:$0xff]  ;;  %p1901_p10 = pnand %p1900_p2, %p1896_p8 }
  0x45   : > { %632 = vmatpush.msra.mxu2 %v369_v22  ;;  %745 = vmatpush.msra.mxu3 %v370_v23  ;;  %v358_v35 = vld [vmem:[#allocation5 + $0xf8] sm:$0xff]  ;;  %v351_v36 = vld [vmem:[#allocation5 + $0xc0] sm:$0xff]  ;;  %v352_v37 = vld [vmem:[#allocation5 + $0xc8] sm:$0xff] }
  0x46   : > { %407 = vmatpush.msra.mxu0 %v363_v24  ;;  %520 = vmatpush.msra.mxu1 %v364_v25  ;;  %v353_v38 = vld [vmem:[#allocation5 + $0xd0] sm:$0xff]  ;;  %v354_v39 = vld [vmem:[#allocation5 + $0xd8] sm:$0xff]  ;;  %v347_v40 = vld [vmem:[#allocation5 + $0xa0] sm:$0xff] }
  0x47   : > { %633 = vmatpush.msra.mxu2 %v365_v26  ;;  %746 = vmatpush.msra.mxu3 %v366_v27  ;;  %v348_v41 = vld [vmem:[#allocation5 + $0xa8] sm:$0xff]  ;;  %v349_v42 = vld [vmem:[#allocation5 + $0xb0] sm:$0xff]  ;;  %v350_v43 = vld [vmem:[#allocation5 + $0xb8] sm:$0xff] }
  0x48   : > { %408 = vmatpush.msra.mxu0 %v359_v28  ;;  %521 = vmatpush.msra.mxu1 %v360_v29  ;;  %v343_v44 = vld [vmem:[#allocation5 + $0x80] sm:$0xff]  ;;  %v344_v45 = vld [vmem:[#allocation5 + $0x88] sm:$0xff]  ;;  %v345_v46 = vld [vmem:[#allocation5 + $0x90] sm:$0xff] }
  0x49   : > { %634 = vmatpush.msra.mxu2 %v361_v30  ;;  %747 = vmatpush.msra.mxu3 %v362_v31  ;;  %v346_v47 = vld [vmem:[#allocation5 + $0x98] sm:$0xff]  ;;  %v339_v48 = vld [vmem:[#allocation5 + $0x60] sm:$0xff]  ;;  %v340_v49 = vld [vmem:[#allocation5 + $0x68] sm:$0xff] }
  0x4a   : > { %409 = vmatpush.msra.mxu0 %v355_v32  ;;  %522 = vmatpush.msra.mxu1 %v356_v33  ;;  %v341_v50 = vld [vmem:[#allocation5 + $0x70] sm:$0xff]  ;;  %v342_v51 = vld [vmem:[#allocation5 + $0x78] sm:$0xff]  ;;  %v335_v52 = vld [vmem:[#allocation5 + $0x40] sm:$0xff] }
  0x4b   : > { %635 = vmatpush.msra.mxu2 %v357_v34  ;;  %748 = vmatpush.msra.mxu3 %v358_v35  ;;  %v336_v53 = vld [vmem:[#allocation5 + $0x48] sm:$0xff]  ;;  %v337_v54 = vld [vmem:[#allocation5 + $0x50] sm:$0xff]  ;;  %v338_v55 = vld [vmem:[#allocation5 + $0x58] sm:$0xff] }
  0x4c   : > { %410 = vmatpush.msra.mxu0 %v351_v36  ;;  %523 = vmatpush.msra.mxu1 %v352_v37  ;;  %v331_v56 = vld [vmem:[#allocation5 + $0x20] sm:$0xff]  ;;  %v332_v57 = vld [vmem:[#allocation5 + $0x28] sm:$0xff]  ;;  %v333_v58 = vld [vmem:[#allocation5 + $0x30] sm:$0xff] }
  0x4d   : > { %636 = vmatpush.msra.mxu2 %v353_v38  ;;  %749 = vmatpush.msra.mxu3 %v354_v39  ;;  %v334_v59 = vld [vmem:[#allocation5 + $0x38] sm:$0xff]  ;;  %v327_v60 = vld [vmem:[#allocation5] sm:$0xff]  ;;  %v328_v61 = vld [vmem:[#allocation5 + $0x8] sm:$0xff] }
  0x4e   : > { %411 = vmatpush.msra.mxu0 %v347_v40  ;;  %524 = vmatpush.msra.mxu1 %v348_v41  ;;  %v329_v62 = vld [vmem:[#allocation5 + $0x10] sm:$0xff]  ;;  %v330_v63 = vld [vmem:[#allocation5 + $0x18] sm:$0xff]  ;;  %v295_v0 = vld [vmem:[%s2113_s11] sm:$0xff] }
  0x4f   : > { %637 = vmatpush.msra.mxu2 %v349_v42  ;;  %750 = vmatpush.msra.mxu3 %v350_v43  ;;  %v1028_v1 = vld [vmem:[#allocation8 + $0x178] sm:$0xff]  ;;  %v1027_v5 = vld [vmem:[#allocation8 + $0x170] sm:$0xff]  ;;  %v1026_v9 = vld [vmem:[#allocation8 + $0x168] sm:$0xff] }
  0x50   : > { %412 = vmatpush.msra.mxu0 %v343_v44  ;;  %525 = vmatpush.msra.mxu1 %v344_v45  ;;  %v996_v2 = vld [vmem:[#allocation8 + $0x78] sm:$0xff]  ;;  %v995_v6 = vld [vmem:[#allocation8 + $0x70] sm:$0xff]  ;;  %v994_v10 = vld [vmem:[#allocation8 + $0x68] sm:$0xff] }
  0x51   : > { %638 = vmatpush.msra.mxu2 %v345_v46  ;;  %751 = vmatpush.msra.mxu3 %v346_v47  ;;  %v1044_v3 = vld [vmem:[#allocation8 + $0x1f8] sm:$0xff]  ;;  %v1043_v7 = vld [vmem:[#allocation8 + $0x1f0] sm:$0xff]  ;;  %v1042_v11 = vld [vmem:[#allocation8 + $0x1e8] sm:$0xff] }
  0x52   : > { %413 = vmatpush.msra.mxu0 %v339_v48  ;;  %526 = vmatpush.msra.mxu1 %v340_v49  ;;  %v1012_v4 = vld [vmem:[#allocation8 + $0xf8] sm:$0xff]  ;;  %v1011_v8 = vld [vmem:[#allocation8 + $0xf0] sm:$0xff]  ;;  %v1010_v12 = vld [vmem:[#allocation8 + $0xe8] sm:$0xff] }
  0x53   : > { %639 = vmatpush.msra.mxu2 %v341_v50  ;;  %752 = vmatpush.msra.mxu3 %v342_v51  ;;  %v296_v13 = vld [vmem:[%s2113_s11 + $0x8] sm:$0xff]  ;;  %v297_v14 = vld [vmem:[%s2113_s11 + $0x10] sm:$0xff]  ;;  %v298_v19 = vld [vmem:[%s2113_s11 + $0x18] sm:$0xff] }
  0x54   : > { %414 = vmatpush.msra.mxu0 %v335_v52  ;;  %527 = vmatpush.msra.mxu1 %v336_v53  ;;  %v1025_v15 = vld [vmem:[#allocation8 + $0x160] sm:$0xff]  ;;  %v1024_v21 = vld [vmem:[#allocation8 + $0x158] sm:$0xff]  ;;  %v301_v26 = vld [vmem:[%s2113_s11 + $0x30] sm:$0xff] }
  0x55   : > { %640 = vmatpush.msra.mxu2 %v337_v54  ;;  %753 = vmatpush.msra.mxu3 %v338_v55  ;;  %v993_v16 = vld [vmem:[#allocation8 + $0x60] sm:$0xff]  ;;  %v992_v22 = vld [vmem:[#allocation8 + $0x58] sm:$0xff]  ;;  %v1023_v27 = vld [vmem:[#allocation8 + $0x150] sm:$0xff] }
  0x56   : > { %415 = vmatpush.msra.mxu0 %v331_v56  ;;  %528 = vmatpush.msra.mxu1 %v332_v57  ;;  %v1041_v17 = vld [vmem:[#allocation8 + $0x1e0] sm:$0xff]  ;;  %v1040_v23 = vld [vmem:[#allocation8 + $0x1d8] sm:$0xff]  ;;  %v991_v28 = vld [vmem:[#allocation8 + $0x50] sm:$0xff] }
  0x57   : > { %641 = vmatpush.msra.mxu2 %v333_v58  ;;  %754 = vmatpush.msra.mxu3 %v334_v59  ;;  %v1009_v18 = vld [vmem:[#allocation8 + $0xe0] sm:$0xff]  ;;  %v1008_v24 = vld [vmem:[#allocation8 + $0xd8] sm:$0xff]  ;;  %v1039_v29 = vld [vmem:[#allocation8 + $0x1d0] sm:$0xff] }
  0x58   : > { %416 = vmatpush.msra.mxu0 %v327_v60  ;;  %529 = vmatpush.msra.mxu1 %v328_v61  ;;  %v299_v20 = vld [vmem:[%s2113_s11 + $0x20] sm:$0xff]  ;;  %v300_v25 = vld [vmem:[%s2113_s11 + $0x28] sm:$0xff]  ;;  %v1007_v30 = vld [vmem:[#allocation8 + $0xd0] sm:$0xff] }
  0x59   : > { %642 = vmatpush.msra.mxu2 %v329_v62  ;;  %755 = vmatpush.msra.mxu3 %v330_v63  ;;  %v302_v31 = vld [vmem:[%s2113_s11 + $0x38] sm:$0xff]  ;;  %v303_v32 = vld [vmem:[%s2113_s11 + $0x40] sm:$0xff]  ;;  %v1022_v33 = vld [vmem:[#allocation8 + $0x148] sm:$0xff] }
  0x5a   : > { %417 = vmatmul.f32.vlgmr.msra.gmra.mxu0 %v295_v0  ;;  %530 = vmatmul.f32.vlgmr.msra.gmra.mxu1 %v295_v0  ;;  %v990_v34 = vld [vmem:[#allocation8 + $0x48] sm:$0xff]  ;;  %v1021_v39 = vld [vmem:[#allocation8 + $0x140] sm:$0xff]  ;;  %v306_v43 = vld [vmem:[%s2113_s11 + $0x58] sm:$0xff] }
  0x5b   : > { %643 = vmatmul.f32.vlgmr.msra.gmra.mxu2 %v295_v0  ;;  %756 = vmatmul.f32.vlgmr.msra.gmra.mxu3 %v295_v0  ;;  %v1038_v35 = vld [vmem:[#allocation8 + $0x1c8] sm:$0xff]  ;;  %v989_v40 = vld [vmem:[#allocation8 + $0x40] sm:$0xff]  ;;  %v1020_v45 = vld [vmem:[#allocation8 + $0x138] sm:$0xff] }
  0x5c   : > { %1275 = vmatpush.msrb.mxu2 %v1028_v1  ;;  %1049 = vmatpush.msrb.mxu0 %v996_v2  ;;  %v1006_v36 = vld [vmem:[#allocation8 + $0xc8] sm:$0xff]  ;;  %v1037_v41 = vld [vmem:[#allocation8 + $0x1c0] sm:$0xff]  ;;  %v988_v46 = vld [vmem:[#allocation8 + $0x38] sm:$0xff] }
  0x5d   : > { %1388 = vmatpush.msrb.mxu3 %v1044_v3  ;;  %1162 = vmatpush.msrb.mxu1 %v1012_v4  ;;  %v304_v37 = vld [vmem:[%s2113_s11 + $0x48] sm:$0xff]  ;;  %v305_v38 = vld [vmem:[%s2113_s11 + $0x50] sm:$0xff]  ;;  %v307_v44 = vld [vmem:[%s2113_s11 + $0x60] sm:$0xff] }
  0x5e   : > { %1276 = vmatpush.msrb.mxu2 %v1027_v5  ;;  %1050 = vmatpush.msrb.mxu0 %v995_v6  ;;  %v1005_v42 = vld [vmem:[#allocation8 + $0xc0] sm:$0xff]  ;;  %v1036_v47 = vld [vmem:[#allocation8 + $0x1b8] sm:$0xff]  ;;  %v309_v50 = vld [vmem:[%s2113_s11 + $0x70] sm:$0xff] }
  0x5f   : > { %1389 = vmatpush.msrb.mxu3 %v1043_v7  ;;  %1163 = vmatpush.msrb.mxu1 %v1011_v8  ;;  %v308_v48 = vld [vmem:[%s2113_s11 + $0x68] sm:$0xff]  ;;  %v1004_v49 = vld [vmem:[#allocation8 + $0xb8] sm:$0xff]  ;;  %v1019_v51 = vld [vmem:[#allocation8 + $0x130] sm:$0xff] }
  0x60   : > { %1277 = vmatpush.msrb.mxu2 %v1026_v9  ;;  %1051 = vmatpush.msrb.mxu0 %v994_v10  ;;  %v987_v52 = vld [vmem:[#allocation8 + $0x30] sm:$0xff]  ;;  %v311_v58 = vld [vmem:[%s2113_s11 + $0x80] sm:$0xff]  ;;  %v1018_v59 = vld [vmem:[#allocation8 + $0x128] sm:$0xff] }
  0x61   : > { %1390 = vmatpush.msrb.mxu3 %v1042_v11  ;;  %1164 = vmatpush.msrb.mxu1 %v1010_v12  ;;  %v1035_v53 = vld [vmem:[#allocation8 + $0x1b0] sm:$0xff]  ;;  %v986_v60 = vld [vmem:[#allocation8 + $0x28] sm:$0xff]  ;;  %v1017_v9 = vld [vmem:[#allocation8 + $0x120] sm:$0xff] }
  0x62   : > { %420 = vmatmul.f32.gmra.mxu0 %v296_v13  ;;  %533 = vmatmul.f32.gmra.mxu1 %v296_v13  ;;  %v310_v54 = vld [vmem:[%s2113_s11 + $0x78] sm:$0xff]  ;;  %v1034_v61 = vld [vmem:[#allocation8 + $0x1a8] sm:$0xff]  ;;  %v985_v10 = vld [vmem:[#allocation8 + $0x20] sm:$0xff] }
  0x63   : > { %646 = vmatmul.f32.gmra.mxu2 %v296_v13  ;;  %759 = vmatmul.f32.gmra.mxu3 %v296_v13  ;;  %v1003_v55 = vld [vmem:[#allocation8 + $0xb0] sm:$0xff]  ;;  %v312_v2 = vld [vmem:[%s2113_s11 + $0x88] sm:$0xff] }
  0x64   : > { %1278 = vmatpush.msrb.mxu2 %v1025_v15  ;;  %1052 = vmatpush.msrb.mxu0 %v993_v16  ;;  %v1002_v3 = vld [vmem:[#allocation8 + $0xa8] sm:$0xff]  ;;  %v1033_v11 = vld [vmem:[#allocation8 + $0x1a0] sm:$0xff]  ;;  %v314_v16 = vld [vmem:[%s2113_s11 + $0x98] sm:$0xff] }
  0x65   : > { %1391 = vmatpush.msrb.mxu3 %v1041_v17  ;;  %1165 = vmatpush.msrb.mxu1 %v1009_v18  ;;  %v313_v8 = vld [vmem:[%s2113_s11 + $0x90] sm:$0xff]  ;;  %v1001_v17 = vld [vmem:[#allocation8 + $0xa0] sm:$0xff] }
  0x66   : > { %1279 = vmatpush.msrb.mxu2 %v1024_v21  ;;  %1053 = vmatpush.msrb.mxu0 %v992_v22  ;;  %v315_v22 = vld [vmem:[%s2113_s11 + $0xa0] sm:$0xff] }
  0x67   : > { %1392 = vmatpush.msrb.mxu3 %v1040_v23  ;;  %1166 = vmatpush.msrb.mxu1 %v1008_v24  ;;  %v1016_v23 = vld [vmem:[#allocation8 + $0x118] sm:$0xff] }
  0x68   : > { %1280 = vmatpush.msrb.mxu2 %v1023_v27  ;;  %1054 = vmatpush.msrb.mxu0 %v991_v28  ;;  %v984_v24 = vld [vmem:[#allocation8 + $0x18] sm:$0xff] }
  0x69   : > { %1393 = vmatpush.msrb.mxu3 %v1039_v29  ;;  %1167 = vmatpush.msrb.mxu1 %v1007_v30  ;;  %v316_v30 = vld [vmem:[%s2113_s11 + $0xa8] sm:$0xff] }
  0x6a   : > { %423 = vmatmul.f32.gmra.mxu0 %v297_v14  ;;  %536 = vmatmul.f32.gmra.mxu1 %v297_v14 }
  0x6b   : > { %649 = vmatmul.f32.gmra.mxu2 %v297_v14  ;;  %762 = vmatmul.f32.gmra.mxu3 %v297_v14 }
  0x6c   : > { %1281 = vmatpush.msrb.mxu2 %v1022_v33  ;;  %1055 = vmatpush.msrb.mxu0 %v990_v34 }
  0x6d   : > { %1394 = vmatpush.msrb.mxu3 %v1038_v35  ;;  %1168 = vmatpush.msrb.mxu1 %v1006_v36  ;;  %v317_v36 = vld [vmem:[%s2113_s11 + $0xb0] sm:$0xff] }
  0x6e   : > { %1282 = vmatpush.msrb.mxu2 %v1021_v39  ;;  %1056 = vmatpush.msrb.mxu0 %v989_v40  ;;  %v1031_v39 = vld [vmem:[#allocation8 + $0x190] sm:$0xff] }
  0x6f   : > { %1395 = vmatpush.msrb.mxu3 %v1037_v41  ;;  %1169 = vmatpush.msrb.mxu1 %v1005_v42 }
  0x70   : > { %1283 = vmatpush.msrb.mxu2 %v1020_v45  ;;  %1057 = vmatpush.msrb.mxu0 %v988_v46  ;;  %v999_v45 = vld [vmem:[#allocation8 + $0x90] sm:$0xff] }
  0x71   : > { %1396 = vmatpush.msrb.mxu3 %v1036_v47  ;;  %1170 = vmatpush.msrb.mxu1 %v1004_v49 }
  0x72   : > { %426 = vmatmul.f32.gmra.mxu0 %v298_v19  ;;  %539 = vmatmul.f32.gmra.mxu1 %v298_v19 }
  0x73   : > { %652 = vmatmul.f32.gmra.mxu2 %v298_v19  ;;  %765 = vmatmul.f32.gmra.mxu3 %v298_v19 }
  0x74   : > { %1284 = vmatpush.msrb.mxu2 %v1019_v51  ;;  %1058 = vmatpush.msrb.mxu0 %v987_v52  ;;  %v1014_v51 = vld [vmem:[#allocation8 + $0x108] sm:$0xff] }
  0x75   : > { %1397 = vmatpush.msrb.mxu3 %v1035_v53  ;;  %1171 = vmatpush.msrb.mxu1 %v1003_v55  ;;  %v982_v52 = vld [vmem:[#allocation8 + $0x8] sm:$0xff] }
  0x76   : > { %1285 = vmatpush.msrb.mxu2 %v1018_v59  ;;  %1059 = vmatpush.msrb.mxu0 %v986_v60  ;;  %v1030_v53 = vld [vmem:[#allocation8 + $0x188] sm:$0xff] }
  0x77   : > { %1398 = vmatpush.msrb.mxu3 %v1034_v61  ;;  %1172 = vmatpush.msrb.mxu1 %v1002_v3  ;;  %v320_v60 = vld [vmem:[%s2113_s11 + $0xc8] sm:$0xff] }
  0x78   : > { %1286 = vmatpush.msrb.mxu2 %v1017_v9  ;;  %1060 = vmatpush.msrb.mxu0 %v985_v10  ;;  %v998_v61 = vld [vmem:[#allocation8 + $0x88] sm:$0xff] }
  0x79   : > { %1399 = vmatpush.msrb.mxu3 %v1033_v11  ;;  %1173 = vmatpush.msrb.mxu1 %v1001_v17  ;;  %v321_v10 = vld [vmem:[%s2113_s11 + $0xd0] sm:$0xff]  ;;  %v1013_v11 = vld [vmem:[#allocation8 + $0x100] sm:$0xff] }
  0x7a   : > { %429 = vmatmul.f32.gmra.mxu0 %v299_v20  ;;  %542 = vmatmul.f32.gmra.mxu1 %v299_v20  ;;  %v1029_v17 = vld [vmem:[#allocation8 + $0x180] sm:$0xff] }
  0x7b   : > { %655 = vmatmul.f32.gmra.mxu2 %v299_v20  ;;  %768 = vmatmul.f32.gmra.mxu3 %v299_v20 }
  0x7c   : > { %1287 = vmatpush.msrb.mxu2 %v1016_v23  ;;  %1061 = vmatpush.msrb.mxu0 %v984_v24 }
  0x82   : > { %432 = vmatmul.f32.gmra.mxu0 %v300_v25  ;;  %545 = vmatmul.f32.gmra.mxu1 %v300_v25 }
  0x83   : > { %658 = vmatmul.f32.gmra.mxu2 %v300_v25  ;;  %771 = vmatmul.f32.gmra.mxu3 %v300_v25  ;;  %v1032_v25 = vld [vmem:[#allocation8 + $0x198] sm:$0xff] }
  0x84   : > { %1400 = vmatpush.msrb.mxu3 %v1032_v25 }
  0x86   : > { %1401 = vmatpush.msrb.mxu3 %v1031_v39 }
  0x88   : > { %1402 = vmatpush.msrb.mxu3 %v1030_v53  ;;  %v324_v53 = vld [vmem:[%s2113_s11 + $0xe8] sm:$0xff] }
  0x8a   : > { %435 = vmatmul.f32.gmra.mxu0 %v301_v26  ;;  %548 = vmatmul.f32.gmra.mxu1 %v301_v26 }
  0x8b   : > { %661 = vmatmul.f32.gmra.mxu2 %v301_v26  ;;  %774 = vmatmul.f32.gmra.mxu3 %v301_v26 }
  0x8c   : > { %1403 = vmatpush.msrb.mxu3 %v1029_v17  ;;  %v391_v17 = vld [vmem:[#allocation7] sm:$0xf] }
  0x92   : > { %438 = vmatmul.f32.gmra.mxu0 %v302_v31  ;;  %551 = vmatmul.f32.gmra.mxu1 %v302_v31 }
  0x93   : > { %664 = vmatmul.f32.gmra.mxu2 %v302_v31  ;;  %777 = vmatmul.f32.gmra.mxu3 %v302_v31  ;;  %v1000_v31 = vld [vmem:[#allocation8 + $0x98] sm:$0xff] }
  0x94   : > { %1174 = vmatpush.msrb.mxu1 %v1000_v31  ;;  %v997_v31 = vld [vmem:[#allocation8 + $0x80] sm:$0xff] }
  0x96   : > { %1175 = vmatpush.msrb.mxu1 %v999_v45 }
  0x98   : > { %1176 = vmatpush.msrb.mxu1 %v998_v61 }
  0x9a   : > { %441 = vmatmul.f32.gmra.mxu0 %v303_v32  ;;  %554 = vmatmul.f32.gmra.mxu1 %v303_v32 }
  0x9b   : > { %667 = vmatmul.f32.gmra.mxu2 %v303_v32  ;;  %780 = vmatmul.f32.gmra.mxu3 %v303_v32 }
  0x9c   : > { %1177 = vmatpush.msrb.mxu1 %v997_v31 }
  0xa2   : > { %444 = vmatmul.f32.gmra.mxu0 %v304_v37  ;;  %557 = vmatmul.f32.gmra.mxu1 %v304_v37 }
  0xa3   : > { %670 = vmatmul.f32.gmra.mxu2 %v304_v37  ;;  %783 = vmatmul.f32.gmra.mxu3 %v304_v37  ;;  %v1015_v37 = vld [vmem:[#allocation8 + $0x110] sm:$0xff] }
  0xa4   : > { %1288 = vmatpush.msrb.mxu2 %v1015_v37 }
  0xa6   : > { %1289 = vmatpush.msrb.mxu2 %v1014_v51 }
  0xa8   : > { %1290 = vmatpush.msrb.mxu2 %v1013_v11 }
  0xaa   : > { %447 = vmatmul.f32.gmra.mxu0 %v305_v38  ;;  %560 = vmatmul.f32.gmra.mxu1 %v305_v38 }
  0xab   : > { %673 = vmatmul.f32.gmra.mxu2 %v305_v38  ;;  %786 = vmatmul.f32.gmra.mxu3 %v305_v38  ;;  %v983_v38 = vld [vmem:[#allocation8 + $0x10] sm:$0xff] }
  0xac   : > { %1062 = vmatpush.msrb.mxu0 %v983_v38 }
  0xae   : > { %1063 = vmatpush.msrb.mxu0 %v982_v52 }
  0xb2   : > { %450 = vmatmul.f32.gmra.mxu0 %v306_v43  ;;  %563 = vmatmul.f32.gmra.mxu1 %v306_v43 }
  0xb3   : > { %676 = vmatmul.f32.gmra.mxu2 %v306_v43  ;;  %789 = vmatmul.f32.gmra.mxu3 %v306_v43 }
  0xba   : > { %453 = vmatmul.f32.gmra.mxu0 %v307_v44  ;;  %566 = vmatmul.f32.gmra.mxu1 %v307_v44 }
  0xbb   : > { %679 = vmatmul.f32.gmra.mxu2 %v307_v44  ;;  %792 = vmatmul.f32.gmra.mxu3 %v307_v44  ;;  %v318_v44 = vld [vmem:[%s2113_s11 + $0xb8] sm:$0xff] }
  0xc2   : > { %456 = vmatmul.f32.gmra.mxu0 %v308_v48  ;;  %569 = vmatmul.f32.gmra.mxu1 %v308_v48 }
  0xc3   : > { %682 = vmatmul.f32.gmra.mxu2 %v308_v48  ;;  %795 = vmatmul.f32.gmra.mxu3 %v308_v48 }
  0xca   : > { %459 = vmatmul.f32.gmra.mxu0 %v309_v50  ;;  %572 = vmatmul.f32.gmra.mxu1 %v309_v50 }
  0xcb   : > { %685 = vmatmul.f32.gmra.mxu2 %v309_v50  ;;  %798 = vmatmul.f32.gmra.mxu3 %v309_v50  ;;  %v319_v50 = vld [vmem:[%s2113_s11 + $0xc0] sm:$0xff] }
  0xd2   : > { %462 = vmatmul.f32.gmra.mxu0 %v310_v54  ;;  %575 = vmatmul.f32.gmra.mxu1 %v310_v54 }
  0xd3   : > { %688 = vmatmul.f32.gmra.mxu2 %v310_v54  ;;  %801 = vmatmul.f32.gmra.mxu3 %v310_v54 }
  0xd7   : > { %v2143_v56 = vpop.f32.mrf.mxu0  ;;  %v2145_v57 = vpop.f32.mrf.mxu1 }
  0xda   : > { %465 = vmatmul.f32.gmra.mxu0 %v311_v58  ;;  %578 = vmatmul.f32.gmra.mxu1 %v311_v58 }
  0xdb   : > { %691 = vmatmul.f32.gmra.mxu2 %v311_v58  ;;  %804 = vmatmul.f32.gmra.mxu3 %v311_v58 }
  0xde   : > { %v2148_v62 = vpop.f32.mrf.mxu2  ;;  %v2150_v63 = vpop.f32.mrf.mxu3 }
  0xdf   : > { %v2152_v0 = vpop.f32.mrf.mxu0  ;;  %v2154_v1 = vpop.f32.mrf.mxu1 }
  0xe2   : > { %468 = vmatmul.f32.gmra.mxu0 %v312_v2  ;;  %581 = vmatmul.f32.gmra.mxu1 %v312_v2 }
  0xe3   : > { %694 = vmatmul.f32.gmra.mxu2 %v312_v2  ;;  %807 = vmatmul.f32.gmra.mxu3 %v312_v2 }
  0xe6   : > { %v2157_v4 = vpop.f32.mrf.mxu2  ;;  %v2159_v5 = vpop.f32.mrf.mxu3 }
  0xe7   : > { %v2161_v6 = vpop.f32.mrf.mxu0  ;;  %v2163_v7 = vpop.f32.mrf.mxu1 }
  0xea   : > { %471 = vmatmul.f32.gmra.mxu0 %v313_v8  ;;  %584 = vmatmul.f32.gmra.mxu1 %v313_v8 }
  0xeb   : > { %697 = vmatmul.f32.gmra.mxu2 %v313_v8  ;;  %810 = vmatmul.f32.gmra.mxu3 %v313_v8 }
  0xee   : > { %v2166_v12 = vpop.f32.mrf.mxu2  ;;  %v2168_v13 = vpop.f32.mrf.mxu3 }
  0xef   : > { %v2170_v14 = vpop.f32.mrf.mxu0  ;;  %v2172_v15 = vpop.f32.mrf.mxu1 }
  0xf2   : > { %474 = vmatmul.f32.gmra.mxu0 %v314_v16  ;;  %587 = vmatmul.f32.gmra.mxu1 %v314_v16 }
  0xf3   : > { %700 = vmatmul.f32.gmra.mxu2 %v314_v16  ;;  %813 = vmatmul.f32.gmra.mxu3 %v314_v16  ;;  %v981_v16 = vld [vmem:[#allocation8] sm:$0xff] }
  0xf4   : > { %1064 = vmatpush.msrb.mxu0 %v981_v16  ;;  %v325_v16 = vld [vmem:[%s2113_s11 + $0xf0] sm:$0xff] }
  0xf6   : > { %v2175_v18 = vpop.f32.mrf.mxu2  ;;  %v2177_v19 = vpop.f32.mrf.mxu3 }
  0xf7   : > { %v2179_v20 = vpop.f32.mrf.mxu0  ;;  %v2181_v21 = vpop.f32.mrf.mxu1 }
  0xfa   : > { %477 = vmatmul.f32.gmra.mxu0 %v315_v22  ;;  %590 = vmatmul.f32.gmra.mxu1 %v315_v22 }
  0xfb   : > { %703 = vmatmul.f32.gmra.mxu2 %v315_v22  ;;  %816 = vmatmul.f32.gmra.mxu3 %v315_v22 }
  0xfe   : > { %v2184_v26 = vpop.f32.mrf.mxu2  ;;  %v2186_v27 = vpop.f32.mrf.mxu3 }
  0xff   : > { %v2188_v28 = vpop.f32.mrf.mxu0  ;;  %v2190_v29 = vpop.f32.mrf.mxu1 }
 0x102   : > { %480 = vmatmul.f32.gmra.mxu0 %v316_v30  ;;  %593 = vmatmul.f32.gmra.mxu1 %v316_v30 }
 0x103   : > { %706 = vmatmul.f32.gmra.mxu2 %v316_v30  ;;  %819 = vmatmul.f32.gmra.mxu3 %v316_v30  ;;  %v322_v30 = vld [vmem:[%s2113_s11 + $0xd8] sm:$0xff] }
 0x106   : > { %v2193_v32 = vpop.f32.mrf.mxu2  ;;  %v2195_v33 = vpop.f32.mrf.mxu3 }
 0x107   : > { %v2197_v34 = vpop.f32.mrf.mxu0  ;;  %v2199_v35 = vpop.f32.mrf.mxu1 }
 0x10a   : > { %483 = vmatmul.f32.gmra.mxu0 %v317_v36  ;;  %596 = vmatmul.f32.gmra.mxu1 %v317_v36 }
 0x10b   : > { %709 = vmatmul.f32.gmra.mxu2 %v317_v36  ;;  %822 = vmatmul.f32.gmra.mxu3 %v317_v36 }
 0x10e   : > { %v2202_v40 = vpop.f32.mrf.mxu2  ;;  %v2204_v41 = vpop.f32.mrf.mxu3 }
 0x10f   : > { %v2206_v42 = vpop.f32.mrf.mxu0  ;;  %v2208_v43 = vpop.f32.mrf.mxu1 }
 0x112   : > { %486 = vmatmul.f32.gmra.mxu0 %v318_v44  ;;  %599 = vmatmul.f32.gmra.mxu1 %v318_v44 }
 0x113   : > { %712 = vmatmul.f32.gmra.mxu2 %v318_v44  ;;  %825 = vmatmul.f32.gmra.mxu3 %v318_v44  ;;  %v323_v44 = vld [vmem:[%s2113_s11 + $0xe0] sm:$0xff] }
 0x116   : > { %v2211_v46 = vpop.f32.mrf.mxu2  ;;  %v2213_v47 = vpop.f32.mrf.mxu3 }
 0x117   : > { %v2215_v48 = vpop.f32.mrf.mxu0  ;;  %v2217_v49 = vpop.f32.mrf.mxu1 }
 0x11a   : > { %489 = vmatmul.f32.gmra.mxu0 %v319_v50  ;;  %602 = vmatmul.f32.gmra.mxu1 %v319_v50 }
 0x11b   : > { %715 = vmatmul.f32.gmra.mxu2 %v319_v50  ;;  %828 = vmatmul.f32.gmra.mxu3 %v319_v50 }
 0x11e   : > { %v2220_v54 = vpop.f32.mrf.mxu2  ;;  %v2222_v55 = vpop.f32.mrf.mxu3 }
 0x11f   : > { %v2224_v58 = vpop.f32.mrf.mxu0  ;;  %v2226_v59 = vpop.f32.mrf.mxu1 }
 0x122   : > { %492 = vmatmul.f32.gmra.mxu0 %v320_v60  ;;  %605 = vmatmul.f32.gmra.mxu1 %v320_v60 }
 0x123   : > { %718 = vmatmul.f32.gmra.mxu2 %v320_v60  ;;  %831 = vmatmul.f32.gmra.mxu3 %v320_v60 }
 0x126   : > { %v2229_v2 = vpop.f32.mrf.mxu2  ;;  %v2231_v3 = vpop.f32.mrf.mxu3 }
 0x127   : > { %v2233_v8 = vpop.f32.mrf.mxu0  ;;  %v2235_v9 = vpop.f32.mrf.mxu1 }
 0x12a   : > { %495 = vmatmul.f32.gmra.mxu0 %v321_v10  ;;  %608 = vmatmul.f32.gmra.mxu1 %v321_v10 }
 0x12b   : > { %721 = vmatmul.f32.gmra.mxu2 %v321_v10  ;;  %834 = vmatmul.f32.gmra.mxu3 %v321_v10 }
 0x12e   : > { %v2238_v22 = vpop.f32.mrf.mxu2  ;;  %v2240_v23 = vpop.f32.mrf.mxu3 }
 0x12f   : > { %v2242_v24 = vpop.f32.mrf.mxu0  ;;  %v2244_v25 = vpop.f32.mrf.mxu1 }
 0x132   : > { %498 = vmatmul.f32.gmra.mxu0 %v322_v30  ;;  %611 = vmatmul.f32.gmra.mxu1 %v322_v30 }
 0x133   : > { %724 = vmatmul.f32.gmra.mxu2 %v322_v30  ;;  %837 = vmatmul.f32.gmra.mxu3 %v322_v30 }
 0x136   : > { %v2247_v36 = vpop.f32.mrf.mxu2  ;;  %v2249_v37 = vpop.f32.mrf.mxu3 }
 0x137   : > { %v2251_v38 = vpop.f32.mrf.mxu0  ;;  %v2253_v39 = vpop.f32.mrf.mxu1 }
 0x138   : > { %2800 = vst [vmem:[#allocation15_spill] sm:$0xff] %v2253_v39 }
 0x13a   : > { %501 = vmatmul.f32.gmra.mxu0 %v323_v44  ;;  %614 = vmatmul.f32.gmra.mxu1 %v323_v44 }
 0x13b   : > { %727 = vmatmul.f32.gmra.mxu2 %v323_v44  ;;  %840 = vmatmul.f32.gmra.mxu3 %v323_v44 }
 0x13e   : > { %v2256_v45 = vpop.f32.mrf.mxu2  ;;  %v2258_v50 = vpop.f32.mrf.mxu3 }
 0x13f   : > { %2801 = vst [vmem:[#allocation16_spill] sm:$0xff] %v2256_v45  ;;  %v2260_v51 = vpop.f32.mrf.mxu0  ;;  %v2262_v52 = vpop.f32.mrf.mxu1 }
 0x140   : > { %2802 = vst [vmem:[#allocation17_spill] sm:$0xff] %v2258_v50 }
 0x141   : > { %2803 = vst [vmem:[#allocation18_spill] sm:$0xff] %v2260_v51 }
 0x142   : > { %2804 = vst [vmem:[#allocation19_spill] sm:$0xff] %v2262_v52  ;;  %504 = vmatmul.f32.gmra.mxu0 %v324_v53  ;;  %617 = vmatmul.f32.gmra.mxu1 %v324_v53  ;;  %v2289_v52 = vperm.slane %v391_v17, 3 }
 0x143   : > { %730 = vmatmul.f32.gmra.mxu2 %v324_v53  ;;  %843 = vmatmul.f32.gmra.mxu3 %v324_v53 }
 0x146   : > { %v2265_v60 = vpop.f32.mrf.mxu2  ;;  %v2267_v61 = vpop.f32.mrf.mxu3 }
 0x147   : > { %2805 = vst [vmem:[#allocation20_spill] sm:$0xff] %v2265_v60  ;;  %v2269_v10 = vpop.f32.mrf.mxu0  ;;  %v2271_v11 = vpop.f32.mrf.mxu1  ;;  %v326_v60 = vld [vmem:[%s2113_s11 + $0xf8] sm:$0xff] }
 0x148   : > { %2806 = vst [vmem:[#allocation21_spill] sm:$0xff] %v2267_v61  ;;  %v2283_v61 = vperm.slane %v391_v17, 0 }
 0x149   : > { %2807 = vst [vmem:[#allocation22_spill] sm:$0xff] %v2269_v10  ;;  %v2285_v10 = vperm.slane %v391_v17, 1 }
 0x14a   : > { %2808 = vst [vmem:[#allocation23_spill] sm:$0xff] %v2271_v11  ;;  %507 = vmatmul.f32.gmra.mxu0 %v325_v16  ;;  %620 = vmatmul.f32.gmra.mxu1 %v325_v16  ;;  %v2287_v11 = vperm.slane %v391_v17, 2 }
 0x14b   : > { %733 = vmatmul.f32.gmra.mxu2 %v325_v16  ;;  %846 = vmatmul.f32.gmra.mxu3 %v325_v16  ;;  %v419_v16 = vadd.f32 %v2143_v56, %v2283_v61 }
 0x14e   : > { %v2274_v30 = vpop.f32.mrf.mxu2  ;;  %v2276_v31 = vpop.f32.mrf.mxu3 }
 0x14f   : > { %2809 = vst [vmem:[#allocation24_spill] sm:$0xff] %v2274_v30  ;;  %v2278_v44 = vpop.f32.mrf.mxu0  ;;  %v2280_v53 = vpop.f32.mrf.mxu1 }
 0x150   : > { %2810 = vst [vmem:[#allocation25_spill] sm:$0xff] %v2276_v31  ;;  %v758_v31 = vadd.f32 %v2150_v63, %v2289_v52  ;;  %v648_v63 = vadd.f32 %v2157_v4, %v2287_v11  ;;  %v538_v4 = vadd.f32 %v2163_v7, %v2285_v10  ;;  %v428_v7 = vadd.f32 %v2170_v14, %v2283_v61 }
 0x151   : > { %2811 = vst [vmem:[#allocation26_spill] sm:$0xff] %v2278_v44  ;;  %v532_v44 = vadd.f32 %v2145_v57, %v2285_v10  ;;  %v422_v57 = vadd.f32 %v2152_v0, %v2283_v61 }
 0x152   : > { %2812 = vst [vmem:[#allocation27_spill] sm:$0xff] %v2280_v53  ;;  %510 = vmatmul.f32.gmra.mxu0 %v326_v60  ;;  %623 = vmatmul.f32.gmra.mxu1 %v326_v60  ;;  %v645_v53 = vadd.f32 %v2148_v62, %v2287_v11  ;;  %v856_v39 = vmax.f32 %v758_v31, 0.0  ;;  %v535_v62 = vadd.f32 %v2154_v1, %v2285_v10  ;;  %v859_v0 = vmax.f32 %v648_v63, 0.0 }
 0x153   : > { %736 = vmatmul.f32.gmra.mxu2 %v326_v60  ;;  %849 = vmatmul.f32.gmra.mxu3 %v326_v60  ;;  %v853_v60 = vmax.f32 %v419_v16, 0.0  ;;  %v854_v45 = vmax.f32 %v532_v44, 0.0  ;;  %v425_v1 = vadd.f32 %v2161_v6, %v2283_v61 }
 0x154   : > { %v855_v56 = vmax.f32 %v645_v53, 0.0  ;;  %v858_v53 = vmax.f32 %v535_v62, 0.0 }
 0x156   : > { %v2299_v30 = vpop.f32.mrf.mxu2  ;;  %v2301_v17 = vpop.f32.mrf.mxu3 }
 0x157   : > { %v2303_v51 = vpop.f32.mrf.mxu0  ;;  %v2305_v50 = vpop.f32.mrf.mxu1 }
 0x158   : > { %2813 = vst [vmem:[#allocation28_spill] sm:$0xff] %v2305_v50  ;;  %v761_v50 = vadd.f32 %v2159_v5, %v2289_v52  ;;  %v651_v5 = vadd.f32 %v2166_v12, %v2287_v11  ;;  %v541_v12 = vadd.f32 %v2172_v15, %v2285_v10  ;;  %v431_v15 = vadd.f32 %v2179_v20, %v2283_v61 }
 0x15a   : > { %1065 = vmatmul.f32.vlgmr.msrb.gmra.mxu0 %v853_v60  ;;  %1178 = vmatmul.f32.vlgmr.msrb.gmra.mxu1 %v854_v45  ;;  %v860_v60 = vmax.f32 %v761_v50, 0.0  ;;  %v863_v6 = vmax.f32 %v651_v5, 0.0 }
 0x15b   : > { %1291 = vmatmul.f32.vlgmr.msrb.gmra.mxu2 %v855_v56  ;;  %1404 = vmatmul.f32.vlgmr.msrb.gmra.mxu3 %v856_v39  ;;  %v857_v39 = vmax.f32 %v422_v57, 0.0  ;;  %v764_v56 = vadd.f32 %v2168_v13, %v2289_v52  ;;  %v654_v13 = vadd.f32 %v2175_v18, %v2287_v11  ;;  %v544_v18 = vadd.f32 %v2181_v21, %v2285_v10 }
 0x15c   : > { %v434_v21 = vadd.f32 %v2188_v28, %v2283_v61 }
 0x15d   : > { %v867_v14 = vmax.f32 %v654_v13, 0.0 }
 0x15e   : > { %v2315_v16 = vpop.f32.mrf.mxu2  ;;  %v2317_v44 = vpop.f32.mrf.mxu3 }
 0x15f   : > { %v2319_v31 = vpop.f32.mrf.mxu0  ;;  %v2321_v45 = vpop.f32.mrf.mxu1 }
 0x162   : > { %1068 = vmatmul.f32.gmra.mxu0 %v857_v39  ;;  %1181 = vmatmul.f32.gmra.mxu1 %v858_v53  ;;  %v861_v39 = vmax.f32 %v425_v1, 0.0  ;;  %v862_v53 = vmax.f32 %v538_v4, 0.0 }
 0x163   : > { %1294 = vmatmul.f32.gmra.mxu2 %v859_v0  ;;  %1407 = vmatmul.f32.gmra.mxu3 %v860_v60  ;;  %v864_v0 = vmax.f32 %v764_v56, 0.0  ;;  %v767_v60 = vadd.f32 %v2177_v19, %v2289_v52  ;;  %v657_v19 = vadd.f32 %v2184_v26, %v2287_v11  ;;  %v547_v26 = vadd.f32 %v2190_v29, %v2285_v10 }
 0x164   : > { %v437_v29 = vadd.f32 %v2197_v34, %v2283_v61 }
 0x165   : > { %v871_v20 = vmax.f32 %v657_v19, 0.0 }
 0x166   : > { %v2331_v57 = vpop.f32.mrf.mxu2  ;;  %v2333_v62 = vpop.f32.mrf.mxu3 }
 0x167   : > { %v2335_v50 = vpop.f32.mrf.mxu0  ;;  %v2337_v63 = vpop.f32.mrf.mxu1 }
 0x16a   : > { %1071 = vmatmul.f32.gmra.mxu0 %v861_v39  ;;  %1184 = vmatmul.f32.gmra.mxu1 %v862_v53  ;;  %v865_v39 = vmax.f32 %v428_v7, 0.0  ;;  %v866_v53 = vmax.f32 %v541_v12, 0.0 }
 0x16b   : > { %1297 = vmatmul.f32.gmra.mxu2 %v863_v6  ;;  %1410 = vmatmul.f32.gmra.mxu3 %v864_v0  ;;  %v868_v6 = vmax.f32 %v767_v60, 0.0  ;;  %v770_v0 = vadd.f32 %v2186_v27, %v2289_v52  ;;  %v660_v27 = vadd.f32 %v2193_v32, %v2287_v11  ;;  %v550_v32 = vadd.f32 %v2199_v35, %v2285_v10 }
 0x16c   : > { %v440_v35 = vadd.f32 %v2206_v42, %v2283_v61 }
 0x16d   : > { %v875_v28 = vmax.f32 %v660_v27, 0.0 }
 0x16e   : > { %v2347_v1 = vpop.f32.mrf.mxu2  ;;  %v2349_v4 = vpop.f32.mrf.mxu3 }
 0x16f   : > { %v2351_v5 = vpop.f32.mrf.mxu0  ;;  %v2353_v56 = vpop.f32.mrf.mxu1 }
 0x172   : > { %1074 = vmatmul.f32.gmra.mxu0 %v865_v39  ;;  %1187 = vmatmul.f32.gmra.mxu1 %v866_v53  ;;  %v869_v39 = vmax.f32 %v431_v15, 0.0  ;;  %v870_v53 = vmax.f32 %v544_v18, 0.0 }
 0x173   : > { %1300 = vmatmul.f32.gmra.mxu2 %v867_v14  ;;  %1413 = vmatmul.f32.gmra.mxu3 %v868_v6  ;;  %v872_v14 = vmax.f32 %v770_v0, 0.0  ;;  %v773_v6 = vadd.f32 %v2195_v33, %v2289_v52  ;;  %v663_v33 = vadd.f32 %v2202_v40, %v2287_v11  ;;  %v553_v40 = vadd.f32 %v2208_v43, %v2285_v10 }
 0x174   : > { %v443_v43 = vadd.f32 %v2215_v48, %v2283_v61 }
 0x175   : > { %v879_v34 = vmax.f32 %v663_v33, 0.0 }
 0x176   : > { %v2363_v7 = vpop.f32.mrf.mxu2  ;;  %v2365_v12 = vpop.f32.mrf.mxu3 }
 0x177   : > { %v2367_v13 = vpop.f32.mrf.mxu0  ;;  %v2369_v60 = vpop.f32.mrf.mxu1 }
 0x17a   : > { %1077 = vmatmul.f32.gmra.mxu0 %v869_v39  ;;  %1190 = vmatmul.f32.gmra.mxu1 %v870_v53  ;;  %v873_v39 = vmax.f32 %v434_v21, 0.0  ;;  %v874_v53 = vmax.f32 %v547_v26, 0.0 }
 0x17b   : > { %1303 = vmatmul.f32.gmra.mxu2 %v871_v20  ;;  %1416 = vmatmul.f32.gmra.mxu3 %v872_v14  ;;  %v876_v20 = vmax.f32 %v773_v6, 0.0  ;;  %v776_v14 = vadd.f32 %v2204_v41, %v2289_v52  ;;  %v666_v41 = vadd.f32 %v2211_v46, %v2287_v11  ;;  %v556_v46 = vadd.f32 %v2217_v49, %v2285_v10 }
 0x17c   : > { %v446_v49 = vadd.f32 %v2224_v58, %v2283_v61 }
 0x17d   : > { %v883_v42 = vmax.f32 %v666_v41, 0.0 }
 0x17e   : > { %v2379_v15 = vpop.f32.mrf.mxu2  ;;  %v2381_v18 = vpop.f32.mrf.mxu3 }
 0x17f   : > { %v2383_v19 = vpop.f32.mrf.mxu0  ;;  %v2385_v0 = vpop.f32.mrf.mxu1 }
 0x182   : > { %1080 = vmatmul.f32.gmra.mxu0 %v873_v39  ;;  %1193 = vmatmul.f32.gmra.mxu1 %v874_v53  ;;  %v877_v39 = vmax.f32 %v437_v29, 0.0  ;;  %v878_v53 = vmax.f32 %v550_v32, 0.0 }
 0x183   : > { %1306 = vmatmul.f32.gmra.mxu2 %v875_v28  ;;  %1419 = vmatmul.f32.gmra.mxu3 %v876_v20  ;;  %v880_v28 = vmax.f32 %v776_v14, 0.0  ;;  %v779_v20 = vadd.f32 %v2213_v47, %v2289_v52  ;;  %v669_v47 = vadd.f32 %v2220_v54, %v2287_v11  ;;  %v559_v54 = vadd.f32 %v2226_v59, %v2285_v10 }
 0x184   : > { %v449_v59 = vadd.f32 %v2233_v8, %v2283_v61 }
 0x185   : > { %v887_v48 = vmax.f32 %v669_v47, 0.0 }
 0x186   : > { %v2395_v21 = vpop.f32.mrf.mxu2  ;;  %v2397_v26 = vpop.f32.mrf.mxu3 }
 0x187   : > { %v2399_v27 = vpop.f32.mrf.mxu0  ;;  %v2401_v6 = vpop.f32.mrf.mxu1 }
 0x18a   : > { %1083 = vmatmul.f32.gmra.mxu0 %v877_v39  ;;  %1196 = vmatmul.f32.gmra.mxu1 %v878_v53  ;;  %v881_v39 = vmax.f32 %v440_v35, 0.0  ;;  %v882_v53 = vmax.f32 %v553_v40, 0.0 }
 0x18b   : > { %1309 = vmatmul.f32.gmra.mxu2 %v879_v34  ;;  %1422 = vmatmul.f32.gmra.mxu3 %v880_v28  ;;  %v884_v34 = vmax.f32 %v779_v20, 0.0  ;;  %v782_v28 = vadd.f32 %v2222_v55, %v2289_v52  ;;  %v672_v55 = vadd.f32 %v2229_v2, %v2287_v11  ;;  %v562_v2 = vadd.f32 %v2235_v9, %v2285_v10 }
 0x18c   : > { %v452_v9 = vadd.f32 %v2242_v24, %v2283_v61 }
 0x18d   : > { %v891_v58 = vmax.f32 %v672_v55, 0.0 }
 0x18e   : > { %v2411_v29 = vpop.f32.mrf.mxu2  ;;  %v2413_v32 = vpop.f32.mrf.mxu3 }
 0x18f   : > { %v2415_v33 = vpop.f32.mrf.mxu0  ;;  %v2417_v14 = vpop.f32.mrf.mxu1 }
 0x192   : > { %1086 = vmatmul.f32.gmra.mxu0 %v881_v39  ;;  %1199 = vmatmul.f32.gmra.mxu1 %v882_v53  ;;  %v885_v39 = vmax.f32 %v443_v43, 0.0  ;;  %v886_v53 = vmax.f32 %v556_v46, 0.0 }
 0x193   : > { %1312 = vmatmul.f32.gmra.mxu2 %v883_v42  ;;  %1425 = vmatmul.f32.gmra.mxu3 %v884_v34  ;;  %v888_v42 = vmax.f32 %v782_v28, 0.0  ;;  %v785_v34 = vadd.f32 %v2231_v3, %v2289_v52  ;;  %v675_v3 = vadd.f32 %v2238_v22, %v2287_v11  ;;  %v565_v22 = vadd.f32 %v2244_v25, %v2285_v10 }
 0x194   : > { %v455_v25 = vadd.f32 %v2251_v38, %v2283_v61 }
 0x195   : > { %v895_v8 = vmax.f32 %v675_v3, 0.0 }
 0x196   : > { %v2427_v35 = vpop.f32.mrf.mxu2  ;;  %v2429_v40 = vpop.f32.mrf.mxu3 }
 0x197   : > { %v2431_v41 = vpop.f32.mrf.mxu0  ;;  %v2433_v20 = vpop.f32.mrf.mxu1 }
 0x19a   : > { %1089 = vmatmul.f32.gmra.mxu0 %v885_v39  ;;  %1202 = vmatmul.f32.gmra.mxu1 %v886_v53  ;;  %v889_v39 = vmax.f32 %v446_v49, 0.0  ;;  %v890_v53 = vmax.f32 %v559_v54, 0.0 }
 0x19b   : > { %1315 = vmatmul.f32.gmra.mxu2 %v887_v48  ;;  %1428 = vmatmul.f32.gmra.mxu3 %v888_v42  ;;  %v892_v48 = vmax.f32 %v785_v34, 0.0  ;;  %v788_v42 = vadd.f32 %v2240_v23, %v2289_v52  ;;  %v678_v23 = vadd.f32 %v2247_v36, %v2287_v11  ;;  %v2817_v36 = vld [vmem:[#allocation15_spill] sm:$0xff] }
 0x19d   : > { %v899_v24 = vmax.f32 %v678_v23, 0.0 }
 0x19e   : > { %v2443_v43 = vpop.f32.mrf.mxu2  ;;  %v2445_v46 = vpop.f32.mrf.mxu3 }
 0x19f   : > { %v2447_v47 = vpop.f32.mrf.mxu0  ;;  %v2449_v28 = vpop.f32.mrf.mxu1 }
 0x1a2   : > { %1092 = vmatmul.f32.gmra.mxu0 %v889_v39  ;;  %1205 = vmatmul.f32.gmra.mxu1 %v890_v53  ;;  %v893_v39 = vmax.f32 %v449_v59, 0.0  ;;  %v894_v53 = vmax.f32 %v562_v2, 0.0 }
 0x1a3   : > { %1318 = vmatmul.f32.gmra.mxu2 %v891_v58  ;;  %1431 = vmatmul.f32.gmra.mxu3 %v892_v48  ;;  %v896_v58 = vmax.f32 %v788_v42, 0.0  ;;  %v791_v48 = vadd.f32 %v2249_v37, %v2289_v52  ;;  %v568_v37 = vadd.f32 %v2817_v36, %v2285_v10 }
 0x1a6   : > { %v2459_v49 = vpop.f32.mrf.mxu2  ;;  %v2461_v54 = vpop.f32.mrf.mxu3 }
 0x1a7   : > { %v2463_v55 = vpop.f32.mrf.mxu0  ;;  %v2465_v34 = vpop.f32.mrf.mxu1 }
 0x1aa   : > { %1095 = vmatmul.f32.gmra.mxu0 %v893_v39  ;;  %1208 = vmatmul.f32.gmra.mxu1 %v894_v53  ;;  %v897_v39 = vmax.f32 %v452_v9, 0.0  ;;  %v898_v53 = vmax.f32 %v565_v22, 0.0 }
 0x1ab   : > { %1321 = vmatmul.f32.gmra.mxu2 %v895_v8  ;;  %1434 = vmatmul.f32.gmra.mxu3 %v896_v58  ;;  %v900_v8 = vmax.f32 %v791_v48, 0.0  ;;  %v2818_v58 = vld [vmem:[#allocation16_spill] sm:$0xff] }
 0x1ae   : > { %v2475_v59 = vpop.f32.mrf.mxu2  ;;  %v2477_v2 = vpop.f32.mrf.mxu3 }
 0x1af   : > { %2814 = vst [vmem:[#allocation29_spill] sm:$0xff] %v2477_v2  ;;  %v2479_v3 = vpop.f32.mrf.mxu0  ;;  %v2481_v42 = vpop.f32.mrf.mxu1  ;;  %v681_v2 = vadd.f32 %v2818_v58, %v2287_v11 }
 0x1b0   : > { %2815 = vst [vmem:[#allocation30_spill] sm:$0xff] %v2479_v3  ;;  %v2819_v3 = vld [vmem:[#allocation17_spill] sm:$0xff] }
 0x1b1   : > { %2816 = vst [vmem:[#allocation31_spill] sm:$0xff] %v2481_v42  ;;  %v794_v42 = vadd.f32 %v2819_v3, %v2289_v52  ;;  %v903_v38 = vmax.f32 %v681_v2, 0.0  ;;  %v2825_v3 = vld [vmem:[#allocation19_spill] sm:$0xff] }
 0x1b2   : > { %1098 = vmatmul.f32.gmra.mxu0 %v897_v39  ;;  %1211 = vmatmul.f32.gmra.mxu1 %v898_v53  ;;  %v901_v39 = vmax.f32 %v455_v25, 0.0  ;;  %v902_v53 = vmax.f32 %v568_v37, 0.0  ;;  %v571_v58 = vadd.f32 %v2825_v3, %v2285_v10 }
 0x1b3   : > { %1324 = vmatmul.f32.gmra.mxu2 %v899_v24  ;;  %1437 = vmatmul.f32.gmra.mxu3 %v900_v8  ;;  %v904_v24 = vmax.f32 %v794_v42, 0.0  ;;  %v2824_v8 = vld [vmem:[#allocation18_spill] sm:$0xff] }
 0x1b4   : > { %v458_v36 = vadd.f32 %v2824_v8, %v2283_v61 }
 0x1b6   : > { %v2491_v9 = vpop.f32.mrf.mxu2  ;;  %v2493_v22 = vpop.f32.mrf.mxu3 }
 0x1b7   : > { %2820 = vst [vmem:[#allocation15_spill] sm:$0xff] %v2491_v9  ;;  %v2495_v23 = vpop.f32.mrf.mxu0  ;;  %v2497_v48 = vpop.f32.mrf.mxu1 }
 0x1b8   : > { %2821 = vst [vmem:[#allocation16_spill] sm:$0xff] %v2493_v22  ;;  %v2826_v22 = vld [vmem:[#allocation20_spill] sm:$0xff] }
 0x1b9   : > { %2822 = vst [vmem:[#allocation17_spill] sm:$0xff] %v2495_v23  ;;  %v684_v9 = vadd.f32 %v2826_v22, %v2287_v11  ;;  %v2827_v23 = vld [vmem:[#allocation21_spill] sm:$0xff]  ;;  %v2832_v22 = vld [vmem:[#allocation22_spill] sm:$0xff] }
 0x1ba   : > { %2823 = vst [vmem:[#allocation32_spill] sm:$0xff] %v2497_v48  ;;  %1101 = vmatmul.f32.gmra.mxu0 %v901_v39  ;;  %1214 = vmatmul.f32.gmra.mxu1 %v902_v53  ;;  %v797_v48 = vadd.f32 %v2827_v23, %v2289_v52  ;;  %v905_v39 = vmax.f32 %v458_v36, 0.0  ;;  %v906_v53 = vmax.f32 %v571_v58, 0.0  ;;  %v461_v8 = vadd.f32 %v2832_v22, %v2283_v61  ;;  %v2833_v23 = vld [vmem:[#allocation23_spill] sm:$0xff] }
 0x1bb   : > { %1327 = vmatmul.f32.gmra.mxu2 %v903_v38  ;;  %1440 = vmatmul.f32.gmra.mxu3 %v904_v24  ;;  %v907_v38 = vmax.f32 %v684_v9, 0.0  ;;  %v574_v3 = vadd.f32 %v2833_v23, %v2285_v10 }
 0x1bc   : > { %v908_v24 = vmax.f32 %v797_v48, 0.0 }
 0x1be   : > { %v2507_v25 = vpop.f32.mrf.mxu2  ;;  %v2509_v2 = vpop.f32.mrf.mxu3 }
 0x1bf   : > { %2828 = vst [vmem:[#allocation18_spill] sm:$0xff] %v2507_v25  ;;  %v2511_v42 = vpop.f32.mrf.mxu0  ;;  %v2513_v37 = vpop.f32.mrf.mxu1 }
 0x1c0   : > { %2829 = vst [vmem:[#allocation19_spill] sm:$0xff] %v2509_v2  ;;  %v2834_v2 = vld [vmem:[#allocation24_spill] sm:$0xff] }
 0x1c1   : > { %2830 = vst [vmem:[#allocation20_spill] sm:$0xff] %v2511_v42  ;;  %v687_v25 = vadd.f32 %v2834_v2, %v2287_v11  ;;  %v2835_v42 = vld [vmem:[#allocation25_spill] sm:$0xff]  ;;  %v2838_v2 = vld [vmem:[#allocation26_spill] sm:$0xff] }
 0x1c2   : > { %2831 = vst [vmem:[#allocation21_spill] sm:$0xff] %v2513_v37  ;;  %1104 = vmatmul.f32.gmra.mxu0 %v905_v39  ;;  %1217 = vmatmul.f32.gmra.mxu1 %v906_v53  ;;  %v800_v37 = vadd.f32 %v2835_v42, %v2289_v52  ;;  %v909_v39 = vmax.f32 %v461_v8, 0.0  ;;  %v910_v53 = vmax.f32 %v574_v3, 0.0  ;;  %v464_v22 = vadd.f32 %v2838_v2, %v2283_v61  ;;  %v2839_v42 = vld [vmem:[#allocation27_spill] sm:$0xff] }
 0x1c3   : > { %1330 = vmatmul.f32.gmra.mxu2 %v907_v38  ;;  %1443 = vmatmul.f32.gmra.mxu3 %v908_v24  ;;  %v911_v38 = vmax.f32 %v687_v25, 0.0  ;;  %v577_v23 = vadd.f32 %v2839_v42, %v2285_v10  ;;  %v693_v42 = vadd.f32 %v2315_v16, %v2287_v11 }
 0x1c4   : > { %v912_v24 = vmax.f32 %v800_v37, 0.0 }
 0x1c6   : > { %v2523_v36 = vpop.f32.mrf.mxu2  ;;  %v2525_v9 = vpop.f32.mrf.mxu3 }
 0x1c7   : > { %2836 = vst [vmem:[#allocation22_spill] sm:$0xff] %v2525_v9  ;;  %v2527_v48 = vpop.f32.mrf.mxu0  ;;  %v2529_v58 = vpop.f32.mrf.mxu1  ;;  %v690_v9 = vadd.f32 %v2299_v30, %v2287_v11  ;;  %v467_v30 = vadd.f32 %v2303_v51, %v2283_v61 }
 0x1c8   : > { %2837 = vst [vmem:[#allocation23_spill] sm:$0xff] %v2529_v58  ;;  %v803_v58 = vadd.f32 %v2301_v17, %v2289_v52  ;;  %v2842_v17 = vld [vmem:[#allocation28_spill] sm:$0xff] }
 0x1c9   : > { %v580_v2 = vadd.f32 %v2842_v17, %v2285_v10  ;;  %v583_v17 = vadd.f32 %v2321_v45, %v2285_v10 }
 0x1ca   : > { %1107 = vmatmul.f32.gmra.mxu0 %v909_v39  ;;  %1220 = vmatmul.f32.gmra.mxu1 %v910_v53  ;;  %v913_v39 = vmax.f32 %v464_v22, 0.0  ;;  %v914_v53 = vmax.f32 %v577_v23, 0.0 }
 0x1cb   : > { %1333 = vmatmul.f32.gmra.mxu2 %v911_v38  ;;  %1446 = vmatmul.f32.gmra.mxu3 %v912_v24  ;;  %v915_v38 = vmax.f32 %v690_v9, 0.0  ;;  %v916_v24 = vmax.f32 %v803_v58, 0.0  ;;  %v2558_v9 = vld [vmem:[%s2790_s4] ss:$0 sm:$0xff] }
 0x1ce   : > { %v2539_v8 = vpop.f32.mrf.mxu2  ;;  %v2541_v25 = vpop.f32.mrf.mxu3 }
 0x1cf   : > { %v2543_v37 = vpop.f32.mrf.mxu0  ;;  %v2545_v3 = vpop.f32.mrf.mxu1 }
 0x1d0   : > { %2840 = vst [vmem:[#allocation24_spill] sm:$0xff] %v2543_v37 }
 0x1d1   : > { %2841 = vst [vmem:[#allocation25_spill] sm:$0xff] %v2545_v3  ;;  %v806_v3 = vadd.f32 %v2317_v44, %v2289_v52  ;;  %v470_v44 = vadd.f32 %v2319_v31, %v2283_v61 }
 0x1d2   : > { %1110 = vmatmul.f32.gmra.mxu0 %v913_v39  ;;  %1223 = vmatmul.f32.gmra.mxu1 %v914_v53  ;;  %v917_v39 = vmax.f32 %v467_v30, 0.0  ;;  %v918_v53 = vmax.f32 %v580_v2, 0.0  ;;  %v809_v30 = vadd.f32 %v2333_v62, %v2289_v52  ;;  %v586_v62 = vadd.f32 %v2337_v63, %v2285_v10 }
 0x1d3   : > { %1336 = vmatmul.f32.gmra.mxu2 %v915_v38  ;;  %1449 = vmatmul.f32.gmra.mxu3 %v916_v24  ;;  %v919_v38 = vmax.f32 %v693_v42, 0.0  ;;  %v920_v24 = vmax.f32 %v806_v3, 0.0 }
 0x1d4   : > { %v924_v31 = vmax.f32 %v809_v30, 0.0 }
 0x1d6   : > { %v2560_v58 = vpop.f32.mrf.mxu2  ;;  %v2562_v22 = vpop.f32.mrf.mxu3 }
 0x1d7   : > { %2843 = vst [vmem:[#allocation26_spill] sm:$0xff] %v2560_v58  ;;  %v1066_v23 = vpop.f32.mrf.mxu0  ;;  %v1179_v51 = vpop.f32.mrf.mxu1 }
 0x1d8   : > { %2844 = vst [vmem:[#allocation27_spill] sm:$0xff] %v2562_v22  ;;  %v1067_v16 = vadd.f32 %v2558_v9, %v1066_v23  ;;  %v696_v22 = vadd.f32 %v2331_v57, %v2287_v11  ;;  %v473_v57 = vadd.f32 %v2335_v50, %v2283_v61 }
 0x1da   : > { %1113 = vmatmul.f32.gmra.mxu0 %v917_v39  ;;  %1226 = vmatmul.f32.gmra.mxu1 %v918_v53  ;;  %v1180_v3 = vadd.f32 %v1179_v51, %v1067_v16  ;;  %v923_v58 = vmax.f32 %v696_v22, 0.0  ;;  %v699_v22 = vadd.f32 %v2347_v1, %v2287_v11  ;;  %v812_v51 = vadd.f32 %v2349_v4, %v2289_v52 }
 0x1db   : > { %1339 = vmatmul.f32.gmra.mxu2 %v919_v38  ;;  %1452 = vmatmul.f32.gmra.mxu3 %v920_v24  ;;  %v921_v38 = vmax.f32 %v470_v44, 0.0  ;;  %v922_v24 = vmax.f32 %v583_v17, 0.0  ;;  %v476_v1 = vadd.f32 %v2351_v5, %v2283_v61  ;;  %v589_v4 = vadd.f32 %v2353_v56, %v2285_v10 }
 0x1dc   : > { %v928_v50 = vmax.f32 %v812_v51, 0.0 }
 0x1dd   : > { %v930_v51 = vmax.f32 %v589_v4, 0.0 }
 0x1de   : > { %v1292_v2 = vpop.f32.mrf.mxu2  ;;  %v1405_v42 = vpop.f32.mrf.mxu3 }
 0x1df   : > { %v1293_v23 = vadd.f32 %v1292_v2, %v1180_v3  ;;  %v1069_v39 = vpop.f32.mrf.mxu0  ;;  %v1182_v53 = vpop.f32.mrf.mxu1  ;;  %v925_v3 = vmax.f32 %v473_v57, 0.0  ;;  %v926_v2 = vmax.f32 %v586_v62, 0.0 }
 0x1e0   : > { %v1070_v45 = vadd.f32 %v2558_v9, %v1069_v39  ;;  %v702_v39 = vadd.f32 %v2363_v7, %v2287_v11  ;;  %v479_v7 = vadd.f32 %v2367_v13, %v2283_v61 }
 0x1e1   : > { %v1406_v37 = vadd.f32 %v1405_v42, %v1293_v23  ;;  %v927_v42 = vmax.f32 %v699_v22, 0.0  ;;  %v929_v22 = vmax.f32 %v476_v1, 0.0 }
 0x1e2   : > { %1116 = vmatmul.f32.gmra.mxu0 %v921_v38  ;;  %1229 = vmatmul.f32.gmra.mxu1 %v922_v24  ;;  %v1183_v16 = vadd.f32 %v1182_v53, %v1070_v45  ;;  %v815_v53 = vadd.f32 %v2365_v12, %v2289_v52  ;;  %v592_v12 = vadd.f32 %v2369_v60, %v2285_v10 }
 0x1e3   : > { %1501 = vst [vmem:[%s2576_s28] sm:$0xff] %v1406_v37  ;;  %1342 = vmatmul.f32.gmra.mxu2 %v923_v58  ;;  %1455 = vmatmul.f32.gmra.mxu3 %v924_v31 }
 0x1e4   : > { %v932_v5 = vmax.f32 %v815_v53, 0.0  ;;  %v821_v53 = vadd.f32 %v2397_v26, %v2289_v52  ;;  %v598_v26 = vadd.f32 %v2401_v6, %v2285_v10 }
 0x1e6   : > { %v1295_v44 = vpop.f32.mrf.mxu2  ;;  %v1408_v17 = vpop.f32.mrf.mxu3 }
 0x1e7   : > { %v1296_v30 = vadd.f32 %v1295_v44, %v1183_v16  ;;  %v1072_v37 = vpop.f32.mrf.mxu0  ;;  %v1185_v58 = vpop.f32.mrf.mxu1  ;;  %v931_v16 = vmax.f32 %v702_v39, 0.0  ;;  %v708_v39 = vadd.f32 %v2395_v21, %v2287_v11  ;;  %v485_v21 = vadd.f32 %v2399_v27, %v2283_v61 }
 0x1e8   : > { %v1073_v63 = vadd.f32 %v2558_v9, %v1072_v37 }
 0x1e9   : > { %v1409_v23 = vadd.f32 %v1408_v17, %v1296_v30  ;;  %v705_v17 = vadd.f32 %v2379_v15, %v2287_v11  ;;  %v818_v30 = vadd.f32 %v2381_v18, %v2289_v52  ;;  %v482_v15 = vadd.f32 %v2383_v19, %v2283_v61 }
 0x1ea   : > { %1119 = vmatmul.f32.gmra.mxu0 %v925_v3  ;;  %1232 = vmatmul.f32.gmra.mxu1 %v926_v2  ;;  %v1186_v38 = vadd.f32 %v1185_v58, %v1073_v63  ;;  %v934_v63 = vmax.f32 %v592_v12, 0.0  ;;  %v595_v18 = vadd.f32 %v2385_v0, %v2285_v10  ;;  %v940_v19 = vmax.f32 %v821_v53, 0.0 }
 0x1eb   : > { %1502 = vst [vmem:[%s2576_s28 + $0x8] sm:$0xff] %v1409_v23  ;;  %1345 = vmatmul.f32.gmra.mxu2 %v927_v42  ;;  %1458 = vmatmul.f32.gmra.mxu3 %v928_v50  ;;  %v933_v23 = vmax.f32 %v479_v7, 0.0  ;;  %v935_v1 = vmax.f32 %v705_v17, 0.0  ;;  %v936_v13 = vmax.f32 %v818_v30, 0.0 }
 0x1ee   : > { %v1298_v24 = vpop.f32.mrf.mxu2  ;;  %v1411_v31 = vpop.f32.mrf.mxu3 }
 0x1ef   : > { %v1299_v45 = vadd.f32 %v1298_v24, %v1186_v38  ;;  %v1075_v57 = vpop.f32.mrf.mxu0  ;;  %v1188_v62 = vpop.f32.mrf.mxu1 }
 0x1f0   : > { %v1076_v56 = vadd.f32 %v2558_v9, %v1075_v57 }
 0x1f1   : > { %v1412_v44 = vadd.f32 %v1411_v31, %v1299_v45 }
 0x1f2   : > { %1122 = vmatmul.f32.gmra.mxu0 %v929_v22  ;;  %1235 = vmatmul.f32.gmra.mxu1 %v930_v51  ;;  %v1189_v37 = vadd.f32 %v1188_v62, %v1076_v56  ;;  %v937_v22 = vmax.f32 %v482_v15, 0.0  ;;  %v938_v51 = vmax.f32 %v595_v18, 0.0  ;;  %v824_v56 = vadd.f32 %v2413_v32, %v2289_v52 }
 0x1f3   : > { %1503 = vst [vmem:[%s2576_s28 + $0x10] sm:$0xff] %v1412_v44  ;;  %1348 = vmatmul.f32.gmra.mxu2 %v931_v16  ;;  %1461 = vmatmul.f32.gmra.mxu3 %v932_v5  ;;  %v939_v16 = vmax.f32 %v708_v39, 0.0  ;;  %v711_v44 = vadd.f32 %v2411_v29, %v2287_v11  ;;  %v488_v29 = vadd.f32 %v2415_v33, %v2283_v61 }
 0x1f4   : > { %v944_v27 = vmax.f32 %v824_v56, 0.0  ;;  %v601_v32 = vadd.f32 %v2417_v14, %v2285_v10  ;;  %v833_v56 = vadd.f32 %v2461_v54, %v2289_v52  ;;  %v610_v54 = vadd.f32 %v2465_v34, %v2285_v10 }
 0x1f5   : > { %v945_v39 = vmax.f32 %v488_v29, 0.0 }
 0x1f6   : > { %v1301_v58 = vpop.f32.mrf.mxu2  ;;  %v1414_v3 = vpop.f32.mrf.mxu3  ;;  %v946_v53 = vmax.f32 %v601_v32, 0.0 }
 0x1f7   : > { %v1302_v2 = vadd.f32 %v1301_v58, %v1189_v37  ;;  %v1078_v42 = vpop.f32.mrf.mxu0  ;;  %v1191_v50 = vpop.f32.mrf.mxu1 }
 0x1f8   : > { %v1079_v60 = vadd.f32 %v2558_v9, %v1078_v42  ;;  %v943_v42 = vmax.f32 %v711_v44, 0.0  ;;  %v720_v44 = vadd.f32 %v2459_v49, %v2287_v11  ;;  %v497_v49 = vadd.f32 %v2463_v55, %v2283_v61 }
 0x1f9   : > { %v1415_v4 = vadd.f32 %v1414_v3, %v1302_v2  ;;  %v941_v3 = vmax.f32 %v485_v21, 0.0  ;;  %v942_v2 = vmax.f32 %v598_v26, 0.0 }
 0x1fa   : > { %1125 = vmatmul.f32.gmra.mxu0 %v933_v23  ;;  %1238 = vmatmul.f32.gmra.mxu1 %v934_v63  ;;  %v1192_v38 = vadd.f32 %v1191_v50, %v1079_v60  ;;  %v714_v23 = vadd.f32 %v2427_v35, %v2287_v11  ;;  %v827_v63 = vadd.f32 %v2429_v40, %v2289_v52 }
 0x1fb   : > { %1504 = vst [vmem:[%s2576_s28 + $0x18] sm:$0xff] %v1415_v4  ;;  %1351 = vmatmul.f32.gmra.mxu2 %v935_v1  ;;  %1464 = vmatmul.f32.gmra.mxu3 %v936_v13  ;;  %v491_v35 = vadd.f32 %v2431_v41, %v2283_v61  ;;  %v604_v40 = vadd.f32 %v2433_v20, %v2285_v10 }
 0x1fc   : > { %v948_v33 = vmax.f32 %v827_v63, 0.0 }
 0x1fe   : > { %v1304_v24 = vpop.f32.mrf.mxu2  ;;  %v1417_v31 = vpop.f32.mrf.mxu3 }
 0x1ff   : > { %v1305_v45 = vadd.f32 %v1304_v24, %v1192_v38  ;;  %v1081_v57 = vpop.f32.mrf.mxu0  ;;  %v1194_v62 = vpop.f32.mrf.mxu1  ;;  %v947_v38 = vmax.f32 %v714_v23, 0.0 }
 0x200   : > { %v1082_v0 = vadd.f32 %v2558_v9, %v1081_v57 }
 0x201   : > { %v1418_v5 = vadd.f32 %v1417_v31, %v1305_v45  ;;  %v717_v31 = vadd.f32 %v2443_v43, %v2287_v11  ;;  %v830_v45 = vadd.f32 %v2445_v46, %v2289_v52  ;;  %v494_v43 = vadd.f32 %v2447_v47, %v2283_v61 }
 0x202   : > { %1128 = vmatmul.f32.gmra.mxu0 %v937_v22  ;;  %1241 = vmatmul.f32.gmra.mxu1 %v938_v51  ;;  %v1195_v7 = vadd.f32 %v1194_v62, %v1082_v0  ;;  %v950_v0 = vmax.f32 %v604_v40, 0.0  ;;  %v607_v46 = vadd.f32 %v2449_v28, %v2285_v10  ;;  %v956_v47 = vmax.f32 %v833_v56, 0.0 }
 0x203   : > { %1505 = vst [vmem:[%s2576_s28 + $0x20] sm:$0xff] %v1418_v5  ;;  %1354 = vmatmul.f32.gmra.mxu2 %v939_v16  ;;  %1467 = vmatmul.f32.gmra.mxu3 %v940_v19  ;;  %v949_v5 = vmax.f32 %v491_v35, 0.0  ;;  %v951_v21 = vmax.f32 %v717_v31, 0.0  ;;  %v952_v41 = vmax.f32 %v830_v45, 0.0  ;;  %v2849_v35 = vld [vmem:[#allocation16_spill] sm:$0xff] }
 0x204   : > { %v839_v40 = vadd.f32 %v2849_v35, %v2289_v52  ;;  %v735_v35 = vadd.f32 %v2539_v8, %v2287_v11  ;;  %v2858_v8 = vld [vmem:[#allocation24_spill] sm:$0xff] }
 0x206   : > { %v1307_v12 = vpop.f32.mrf.mxu2  ;;  %v1420_v17 = vpop.f32.mrf.mxu3 }
 0x207   : > { %v1308_v30 = vadd.f32 %v1307_v12, %v1195_v7  ;;  %v1084_v37 = vpop.f32.mrf.mxu0  ;;  %v1197_v58 = vpop.f32.mrf.mxu1 }
 0x208   : > { %v1085_v6 = vadd.f32 %v2558_v9, %v1084_v37 }
 0x209   : > { %v1421_v50 = vadd.f32 %v1420_v17, %v1308_v30 }
 0x20a   : > { %1131 = vmatmul.f32.gmra.mxu0 %v941_v3  ;;  %1244 = vmatmul.f32.gmra.mxu1 %v942_v2  ;;  %v1198_v1 = vadd.f32 %v1197_v58, %v1085_v6  ;;  %v953_v3 = vmax.f32 %v494_v43, 0.0  ;;  %v954_v2 = vmax.f32 %v607_v46, 0.0  ;;  %v2845_v6 = vld [vmem:[#allocation29_spill] sm:$0xff]  ;;  %v2851_v43 = vld [vmem:[#allocation32_spill] sm:$0xff] }
 0x20b   : > { %1506 = vst [vmem:[%s2576_s28 + $0x28] sm:$0xff] %v1421_v50  ;;  %1357 = vmatmul.f32.gmra.mxu2 %v943_v42  ;;  %1470 = vmatmul.f32.gmra.mxu3 %v944_v27  ;;  %v955_v42 = vmax.f32 %v720_v44, 0.0  ;;  %v723_v50 = vadd.f32 %v2475_v59, %v2287_v11  ;;  %v836_v29 = vadd.f32 %v2845_v6, %v2289_v52  ;;  %v2846_v59 = vld [vmem:[#allocation30_spill] sm:$0xff] }
 0x20c   : > { %v616_v46 = vadd.f32 %v2851_v43, %v2285_v10  ;;  %v2852_v44 = vld [vmem:[#allocation18_spill] sm:$0xff] }
 0x20d   : > { %v960_v55 = vmax.f32 %v836_v29, 0.0  ;;  %v729_v56 = vadd.f32 %v2852_v44, %v2287_v11  ;;  %v2855_v29 = vld [vmem:[#allocation21_spill] sm:$0xff] }
 0x20e   : > { %v1310_v13 = vpop.f32.mrf.mxu2  ;;  %v1423_v4 = vpop.f32.mrf.mxu3 }
 0x20f   : > { %v1311_v60 = vadd.f32 %v1310_v13, %v1198_v1  ;;  %v1087_v15 = vpop.f32.mrf.mxu0  ;;  %v1200_v18 = vpop.f32.mrf.mxu1 }
 0x210   : > { %v1088_v14 = vadd.f32 %v2558_v9, %v1087_v15  ;;  %v958_v15 = vmax.f32 %v610_v54, 0.0 }
 0x211   : > { %v1424_v24 = vadd.f32 %v1423_v4, %v1311_v60  ;;  %v957_v60 = vmax.f32 %v497_v49, 0.0 }
 0x212   : > { %1134 = vmatmul.f32.gmra.mxu0 %v945_v39  ;;  %1247 = vmatmul.f32.gmra.mxu1 %v946_v53  ;;  %v1201_v57 = vadd.f32 %v1200_v18, %v1088_v14  ;;  %v959_v18 = vmax.f32 %v723_v50, 0.0  ;;  %v500_v53 = vadd.f32 %v2846_v59, %v2283_v61  ;;  %v2854_v50 = vld [vmem:[#allocation20_spill] sm:$0xff] }
 0x213   : > { %1507 = vst [vmem:[%s2576_s28 + $0x30] sm:$0xff] %v1424_v24  ;;  %1360 = vmatmul.f32.gmra.mxu2 %v947_v38  ;;  %1473 = vmatmul.f32.gmra.mxu3 %v948_v33  ;;  %v2847_v38 = vld [vmem:[#allocation31_spill] sm:$0xff]  ;;  %v506_v6 = vadd.f32 %v2854_v50, %v2283_v61 }
 0x214   : > { %v613_v33 = vadd.f32 %v2847_v38, %v2285_v10  ;;  %v2848_v24 = vld [vmem:[#allocation15_spill] sm:$0xff] }
 0x215   : > { %v726_v14 = vadd.f32 %v2848_v24, %v2287_v11  ;;  %v2857_v24 = vld [vmem:[#allocation23_spill] sm:$0xff] }
 0x216   : > { %v1313_v62 = vpop.f32.mrf.mxu2  ;;  %v1426_v22 = vpop.f32.mrf.mxu3 }
 0x217   : > { %v1314_v51 = vadd.f32 %v1313_v62, %v1201_v57  ;;  %v1090_v16 = vpop.f32.mrf.mxu0  ;;  %v1203_v19 = vpop.f32.mrf.mxu1 }
 0x218   : > { %v1091_v20 = vadd.f32 %v2558_v9, %v1090_v16  ;;  %v961_v16 = vmax.f32 %v500_v53, 0.0 }
 0x219   : > { %v1427_v26 = vadd.f32 %v1426_v22, %v1314_v51 }
 0x21a   : > { %1137 = vmatmul.f32.gmra.mxu0 %v949_v5  ;;  %1250 = vmatmul.f32.gmra.mxu1 %v950_v0  ;;  %v1204_v7 = vadd.f32 %v1203_v19, %v1091_v20  ;;  %v962_v19 = vmax.f32 %v613_v33, 0.0  ;;  %v963_v5 = vmax.f32 %v726_v14, 0.0  ;;  %v964_v0 = vmax.f32 %v839_v40, 0.0 }
 0x21b   : > { %1508 = vst [vmem:[%s2576_s28 + $0x38] sm:$0xff] %v1427_v26  ;;  %1363 = vmatmul.f32.gmra.mxu2 %v951_v21  ;;  %1476 = vmatmul.f32.gmra.mxu3 %v952_v41  ;;  %v2850_v26 = vld [vmem:[#allocation17_spill] sm:$0xff]  ;;  %v622_v14 = vadd.f32 %v2857_v24, %v2285_v10  ;;  %v848_v40 = vadd.f32 %v2541_v25, %v2289_v52 }
 0x21c   : > { %v503_v20 = vadd.f32 %v2850_v26, %v2283_v61  ;;  %v512_v25 = vadd.f32 %v2858_v8, %v2283_v61 }
 0x21e   : > { %v1316_v12 = vpop.f32.mrf.mxu2  ;;  %v1429_v17 = vpop.f32.mrf.mxu3 }
 0x21f   : > { %v1317_v30 = vadd.f32 %v1316_v12, %v1204_v7  ;;  %v1093_v37 = vpop.f32.mrf.mxu0  ;;  %v1206_v58 = vpop.f32.mrf.mxu1  ;;  %v2853_v7 = vld [vmem:[#allocation19_spill] sm:$0xff] }
 0x220   : > { %v1094_v28 = vadd.f32 %v2558_v9, %v1093_v37  ;;  %v842_v12 = vadd.f32 %v2853_v7, %v2289_v52 }
 0x221   : > { %v1430_v27 = vadd.f32 %v1429_v17, %v1317_v30 }
 0x222   : > { %1140 = vmatmul.f32.gmra.mxu0 %v953_v3  ;;  %1253 = vmatmul.f32.gmra.mxu1 %v954_v2  ;;  %v1207_v32 = vadd.f32 %v1206_v58, %v1094_v28  ;;  %v968_v28 = vmax.f32 %v842_v12, 0.0 }
 0x223   : > { %1509 = vst [vmem:[%s2576_s28 + $0x40] sm:$0xff] %v1430_v27  ;;  %1366 = vmatmul.f32.gmra.mxu2 %v955_v42  ;;  %1479 = vmatmul.f32.gmra.mxu3 %v956_v47  ;;  %v965_v42 = vmax.f32 %v503_v20, 0.0  ;;  %v966_v47 = vmax.f32 %v616_v46, 0.0  ;;  %v967_v27 = vmax.f32 %v729_v56, 0.0  ;;  %v2860_v20 = vld [vmem:[#allocation26_spill] sm:$0xff]  ;;  %v2861_v46 = vld [vmem:[#allocation27_spill] sm:$0xff] }
 0x224   : > { %v738_v43 = vadd.f32 %v2860_v20, %v2287_v11  ;;  %v851_v44 = vadd.f32 %v2861_v46, %v2289_v52 }
 0x226   : > { %v1319_v23 = vpop.f32.mrf.mxu2  ;;  %v1432_v63 = vpop.f32.mrf.mxu3 }
 0x227   : > { %v1320_v1 = vadd.f32 %v1319_v23, %v1207_v32  ;;  %v1096_v13 = vpop.f32.mrf.mxu0  ;;  %v1209_v4 = vpop.f32.mrf.mxu1  ;;  %v619_v32 = vadd.f32 %v2855_v29, %v2285_v10  ;;  %v732_v23 = vadd.f32 %v2523_v36, %v2287_v11  ;;  %v509_v36 = vadd.f32 %v2527_v48, %v2283_v61 }
 0x228   : > { %v1097_v34 = vadd.f32 %v2558_v9, %v1096_v13  ;;  %v976_v48 = vmax.f32 %v848_v40, 0.0  ;;  %v980_v61 = vmax.f32 %v851_v44, 0.0 }
 0x229   : > { %v1433_v39 = vadd.f32 %v1432_v63, %v1320_v1  ;;  %v2856_v63 = vld [vmem:[#allocation22_spill] sm:$0xff]  ;;  %v971_v59 = vmax.f32 %v732_v23, 0.0 }
 0x22a   : > { %1143 = vmatmul.f32.gmra.mxu0 %v957_v60  ;;  %1256 = vmatmul.f32.gmra.mxu1 %v958_v15  ;;  %v1210_v31 = vadd.f32 %v1209_v4, %v1097_v34  ;;  %v845_v1 = vadd.f32 %v2856_v63, %v2289_v52  ;;  %v970_v34 = vmax.f32 %v619_v32, 0.0 }
 0x22b   : > { %1510 = vst [vmem:[%s2576_s28 + $0x48] sm:$0xff] %v1433_v39  ;;  %1369 = vmatmul.f32.gmra.mxu2 %v959_v18  ;;  %1482 = vmatmul.f32.gmra.mxu3 %v960_v55  ;;  %v969_v39 = vmax.f32 %v506_v6, 0.0 }
 0x22c   : > { %v972_v53 = vmax.f32 %v845_v1, 0.0 }
 0x22e   : > { %v1322_v45 = vpop.f32.mrf.mxu2  ;;  %v1435_v57 = vpop.f32.mrf.mxu3 }
 0x22f   : > { %v1323_v62 = vadd.f32 %v1322_v45, %v1210_v31  ;;  %v1099_v22 = vpop.f32.mrf.mxu0  ;;  %v1212_v51 = vpop.f32.mrf.mxu1 }
 0x230   : > { %v1100_v41 = vadd.f32 %v2558_v9, %v1099_v22 }
 0x231   : > { %v1436_v21 = vadd.f32 %v1435_v57, %v1323_v62 }
 0x232   : > { %1146 = vmatmul.f32.gmra.mxu0 %v961_v16  ;;  %1259 = vmatmul.f32.gmra.mxu1 %v962_v19  ;;  %v1213_v17 = vadd.f32 %v1212_v51, %v1100_v41  ;;  %v973_v16 = vmax.f32 %v509_v36, 0.0  ;;  %v974_v19 = vmax.f32 %v622_v14, 0.0  ;;  %v2859_v41 = vld [vmem:[#allocation25_spill] sm:$0xff] }
 0x233   : > { %1511 = vst [vmem:[%s2576_s28 + $0x50] sm:$0xff] %v1436_v21  ;;  %1372 = vmatmul.f32.gmra.mxu2 %v963_v5  ;;  %1485 = vmatmul.f32.gmra.mxu3 %v964_v0  ;;  %v975_v5 = vmax.f32 %v735_v35, 0.0  ;;  %v625_v26 = vadd.f32 %v2859_v41, %v2285_v10 }
 0x236   : > { %v1325_v30 = vpop.f32.mrf.mxu2  ;;  %v1438_v37 = vpop.f32.mrf.mxu3 }
 0x237   : > { %v1326_v58 = vadd.f32 %v1325_v30, %v1213_v17  ;;  %v1102_v3 = vpop.f32.mrf.mxu0  ;;  %v1215_v2 = vpop.f32.mrf.mxu1 }
 0x238   : > { %v1103_v54 = vadd.f32 %v2558_v9, %v1102_v3  ;;  %v978_v3 = vmax.f32 %v625_v26, 0.0 }
 0x239   : > { %v1439_v49 = vadd.f32 %v1438_v37, %v1326_v58  ;;  %v977_v58 = vmax.f32 %v512_v25, 0.0 }
 0x23a   : > { %1149 = vmatmul.f32.gmra.mxu0 %v965_v42  ;;  %1262 = vmatmul.f32.gmra.mxu1 %v966_v47  ;;  %v1216_v13 = vadd.f32 %v1215_v2, %v1103_v54  ;;  %v979_v2 = vmax.f32 %v738_v43, 0.0 }
 0x23b   : > { %1512 = vst [vmem:[%s2576_s28 + $0x58] sm:$0xff] %v1439_v49  ;;  %1375 = vmatmul.f32.gmra.mxu2 %v967_v27  ;;  %1488 = vmatmul.f32.gmra.mxu3 %v968_v28 }
 0x23e   : > { %v1328_v4 = vpop.f32.mrf.mxu2  ;;  %v1441_v60 = vpop.f32.mrf.mxu3 }
 0x23f   : > { %v1329_v15 = vadd.f32 %v1328_v4, %v1216_v13  ;;  %v1105_v18 = vpop.f32.mrf.mxu0  ;;  %v1218_v55 = vpop.f32.mrf.mxu1 }
 0x240   : > { %v1106_v33 = vadd.f32 %v2558_v9, %v1105_v18 }
 0x241   : > { %v1442_v38 = vadd.f32 %v1441_v60, %v1329_v15 }
 0x242   : > { %1152 = vmatmul.f32.gmra.mxu0 %v969_v39  ;;  %1265 = vmatmul.f32.gmra.mxu1 %v970_v34  ;;  %v1219_v31 = vadd.f32 %v1218_v55, %v1106_v33 }
 0x243   : > { %1513 = vst [vmem:[%s2576_s28 + $0x60] sm:$0xff] %v1442_v38  ;;  %1378 = vmatmul.f32.gmra.mxu2 %v971_v59  ;;  %1491 = vmatmul.f32.gmra.mxu3 %v972_v53 }
 0x246   : > { %v1331_v45 = vpop.f32.mrf.mxu2  ;;  %v1444_v57 = vpop.f32.mrf.mxu3 }
 0x247   : > { %v1332_v62 = vadd.f32 %v1331_v45, %v1219_v31  ;;  %v1108_v22 = vpop.f32.mrf.mxu0  ;;  %v1221_v51 = vpop.f32.mrf.mxu1 }
 0x248   : > { %v1109_v21 = vadd.f32 %v2558_v9, %v1108_v22 }
 0x249   : > { %v1445_v0 = vadd.f32 %v1444_v57, %v1332_v62 }
 0x24a   : > { %1155 = vmatmul.f32.gmra.mxu0 %v973_v16  ;;  %1268 = vmatmul.f32.gmra.mxu1 %v974_v19  ;;  %v1222_v56 = vadd.f32 %v1221_v51, %v1109_v21 }
 0x24b   : > { %1514 = vst [vmem:[%s2576_s28 + $0x68] sm:$0xff] %v1445_v0  ;;  %1381 = vmatmul.f32.gmra.mxu2 %v975_v5  ;;  %1494 = vmatmul.f32.gmra.mxu3 %v976_v48 }
 0x24e   : > { %v1334_v7 = vpop.f32.mrf.mxu2  ;;  %v1447_v12 = vpop.f32.mrf.mxu3 }
 0x24f   : > { %v1335_v17 = vadd.f32 %v1334_v7, %v1222_v56  ;;  %v1111_v30 = vpop.f32.mrf.mxu0  ;;  %v1224_v37 = vpop.f32.mrf.mxu1 }
 0x250   : > { %v1112_v10 = vadd.f32 %v2558_v9, %v1111_v30 }
 0x251   : > { %v1448_v42 = vadd.f32 %v1447_v12, %v1335_v17 }
 0x252   : > { %1158 = vmatmul.f32.gmra.mxu0 %v977_v58  ;;  %1271 = vmatmul.f32.gmra.mxu1 %v978_v3  ;;  %v1225_v52 = vadd.f32 %v1224_v37, %v1112_v10 }
 0x253   : > { %1515 = vst [vmem:[%s2576_s28 + $0x70] sm:$0xff] %v1448_v42  ;;  %1384 = vmatmul.f32.gmra.mxu2 %v979_v2  ;;  %1497 = vmatmul.f32.gmra.mxu3 %v980_v61 }
 0x256   : > { %v1337_v11 = vpop.f32.mrf.mxu2  ;;  %v1450_v47 = vpop.f32.mrf.mxu3 }
 0x257   : > { %v1338_v27 = vadd.f32 %v1337_v11, %v1225_v52  ;;  %v1114_v28 = vpop.f32.mrf.mxu0  ;;  %v1227_v49 = vpop.f32.mrf.mxu1 }
 0x258   : > { %v1115_v50 = vadd.f32 %v2558_v9, %v1114_v28 }
 0x259   : > { %v1451_v54 = vadd.f32 %v1450_v47, %v1338_v27 }
 0x25a   : > { %v1228_v6 = vadd.f32 %v1227_v49, %v1115_v50 }
 0x25b   : > { %1516 = vst [vmem:[%s2576_s28 + $0x78] sm:$0xff] %v1451_v54 }
 0x25e   : > { %v1340_v29 = vpop.f32.mrf.mxu2  ;;  %v1453_v32 = vpop.f32.mrf.mxu3 }
 0x25f   : > { %v1341_v23 = vadd.f32 %v1340_v29, %v1228_v6  ;;  %v1117_v63 = vpop.f32.mrf.mxu0  ;;  %v1230_v1 = vpop.f32.mrf.mxu1 }
 0x260   : > { %v1118_v4 = vadd.f32 %v2558_v9, %v1117_v63 }
 0x261   : > { %v1454_v13 = vadd.f32 %v1453_v32, %v1341_v23 }
 0x262   : > { %v1231_v60 = vadd.f32 %v1230_v1, %v1118_v4 }
 0x263   : > { %1517 = vst [vmem:[%s2576_s28 + $0x80] sm:$0xff] %v1454_v13 }
 0x266   : > { %v1343_v15 = vpop.f32.mrf.mxu2  ;;  %v1456_v18 = vpop.f32.mrf.mxu3 }
 0x267   : > { %v1344_v55 = vadd.f32 %v1343_v15, %v1231_v60  ;;  %v1120_v39 = vpop.f32.mrf.mxu0  ;;  %v1233_v34 = vpop.f32.mrf.mxu1 }
 0x268   : > { %v1121_v53 = vadd.f32 %v2558_v9, %v1120_v39 }
 0x269   : > { %v1457_v59 = vadd.f32 %v1456_v18, %v1344_v55 }
 0x26a   : > { %v1234_v38 = vadd.f32 %v1233_v34, %v1121_v53 }
 0x26b   : > { %1518 = vst [vmem:[%s2576_s28 + $0x88] sm:$0xff] %v1457_v59 }
 0x26e   : > { %v1346_v33 = vpop.f32.mrf.mxu2  ;;  %v1459_v36 = vpop.f32.mrf.mxu3 }
 0x26f   : > { %v1347_v24 = vadd.f32 %v1346_v33, %v1234_v38  ;;  %v1123_v14 = vpop.f32.mrf.mxu0  ;;  %v1236_v35 = vpop.f32.mrf.mxu1 }
 0x270   : > { %v1124_v31 = vadd.f32 %v2558_v9, %v1123_v14 }
 0x271   : > { %v1460_v40 = vadd.f32 %v1459_v36, %v1347_v24 }
 0x272   : > { %v1237_v45 = vadd.f32 %v1236_v35, %v1124_v31 }
 0x273   : > { %1519 = vst [vmem:[%s2576_s28 + $0x90] sm:$0xff] %v1460_v40 }
 0x276   : > { %v1349_v57 = vpop.f32.mrf.mxu2  ;;  %v1462_v62 = vpop.f32.mrf.mxu3 }
 0x277   : > { %v1350_v22 = vadd.f32 %v1349_v57, %v1237_v45  ;;  %v1126_v51 = vpop.f32.mrf.mxu0  ;;  %v1239_v16 = vpop.f32.mrf.mxu1 }
 0x278   : > { %v1127_v5 = vadd.f32 %v2558_v9, %v1126_v51 }
 0x279   : > { %v1463_v19 = vadd.f32 %v1462_v62, %v1350_v22 }
 0x27a   : > { %v1240_v48 = vadd.f32 %v1239_v16, %v1127_v5 }
 0x27b   : > { %1520 = vst [vmem:[%s2576_s28 + $0x98] sm:$0xff] %v1463_v19 }
 0x27e   : > { %v1352_v0 = vpop.f32.mrf.mxu2  ;;  %v1465_v21 = vpop.f32.mrf.mxu3 }
 0x27f   : > { %v1353_v8 = vadd.f32 %v1352_v0, %v1240_v48  ;;  %v1129_v25 = vpop.f32.mrf.mxu0  ;;  %v1242_v41 = vpop.f32.mrf.mxu1 }
 0x280   : > { %v1130_v20 = vadd.f32 %v2558_v9, %v1129_v25 }
 0x281   : > { %v1466_v26 = vadd.f32 %v1465_v21, %v1353_v8 }
 0x282   : > { %v1243_v43 = vadd.f32 %v1242_v41, %v1130_v20 }
 0x283   : > { %1521 = vst [vmem:[%s2576_s28 + $0xa0] sm:$0xff] %v1466_v26 }
 0x286   : > { %v1355_v46 = vpop.f32.mrf.mxu2  ;;  %v1468_v44 = vpop.f32.mrf.mxu3 }
 0x287   : > { %v1356_v56 = vadd.f32 %v1355_v46, %v1243_v43  ;;  %v1132_v7 = vpop.f32.mrf.mxu0  ;;  %v1245_v12 = vpop.f32.mrf.mxu1 }
 0x288   : > { %v1133_v30 = vadd.f32 %v2558_v9, %v1132_v7 }
 0x289   : > { %v1469_v17 = vadd.f32 %v1468_v44, %v1356_v56 }
 0x28a   : > { %v1246_v37 = vadd.f32 %v1245_v12, %v1133_v30 }
 0x28b   : > { %1522 = vst [vmem:[%s2576_s28 + $0xa8] sm:$0xff] %v1469_v17 }
 0x28e   : > { %v1358_v58 = vpop.f32.mrf.mxu2  ;;  %v1471_v3 = vpop.f32.mrf.mxu3 }
 0x28f   : > { %v1359_v2 = vadd.f32 %v1358_v58, %v1246_v37  ;;  %v1135_v61 = vpop.f32.mrf.mxu0  ;;  %v1248_v42 = vpop.f32.mrf.mxu1 }
 0x290   : > { %v1136_v52 = vadd.f32 %v2558_v9, %v1135_v61 }
 0x291   : > { %v1472_v10 = vadd.f32 %v1471_v3, %v1359_v2 }
 0x292   : > { %v1249_v11 = vadd.f32 %v1248_v42, %v1136_v52 }
 0x293   : > { %1523 = vst [vmem:[%s2576_s28 + $0xb0] sm:$0xff] %v1472_v10 }
 0x296   : > { %v1361_v47 = vpop.f32.mrf.mxu2  ;;  %v1474_v27 = vpop.f32.mrf.mxu3 }
 0x297   : > { %v1362_v28 = vadd.f32 %v1361_v47, %v1249_v11  ;;  %v1138_v49 = vpop.f32.mrf.mxu0  ;;  %v1251_v54 = vpop.f32.mrf.mxu1 }
 0x298   : > { %v1139_v6 = vadd.f32 %v2558_v9, %v1138_v49 }
 0x299   : > { %v1475_v50 = vadd.f32 %v1474_v27, %v1362_v28 }
 0x29a   : > { %v1252_v29 = vadd.f32 %v1251_v54, %v1139_v6 }
 0x29b   : > { %1524 = vst [vmem:[%s2576_s28 + $0xb8] sm:$0xff] %v1475_v50 }
 0x29e   : > { %v1364_v32 = vpop.f32.mrf.mxu2  ;;  %v1477_v23 = vpop.f32.mrf.mxu3 }
 0x29f   : > { %v1365_v63 = vadd.f32 %v1364_v32, %v1252_v29  ;;  %v1141_v1 = vpop.f32.mrf.mxu0  ;;  %v1254_v13 = vpop.f32.mrf.mxu1 }
 0x2a0   : > { %v1142_v60 = vadd.f32 %v2558_v9, %v1141_v1 }
 0x2a1   : > { %v1478_v4 = vadd.f32 %v1477_v23, %v1365_v63 }
 0x2a2   : > { %v1255_v15 = vadd.f32 %v1254_v13, %v1142_v60 }
 0x2a3   : > { %1525 = vst [vmem:[%s2576_s28 + $0xc0] sm:$0xff] %v1478_v4 }
 0x2a6   : > { %v1367_v18 = vpop.f32.mrf.mxu2  ;;  %v1480_v55 = vpop.f32.mrf.mxu3 }
 0x2a7   : > { %v1368_v39 = vadd.f32 %v1367_v18, %v1255_v15  ;;  %v1144_v34 = vpop.f32.mrf.mxu0  ;;  %v1257_v59 = vpop.f32.mrf.mxu1 }
 0x2a8   : > { %v1145_v38 = vadd.f32 %v2558_v9, %v1144_v34 }
 0x2a9   : > { %v1481_v53 = vadd.f32 %v1480_v55, %v1368_v39 }
 0x2aa   : > { %v1258_v33 = vadd.f32 %v1257_v59, %v1145_v38 }
 0x2ab   : > { %1526 = vst [vmem:[%s2576_s28 + $0xc8] sm:$0xff] %v1481_v53 }
 0x2ae   : > { %v1370_v36 = vpop.f32.mrf.mxu2  ;;  %v1483_v24 = vpop.f32.mrf.mxu3 }
 0x2af   : > { %v1371_v14 = vadd.f32 %v1370_v36, %v1258_v33  ;;  %v1147_v35 = vpop.f32.mrf.mxu0  ;;  %v1260_v40 = vpop.f32.mrf.mxu1 }
 0x2b0   : > { %v1148_v45 = vadd.f32 %v2558_v9, %v1147_v35 }
 0x2b1   : > { %v1484_v31 = vadd.f32 %v1483_v24, %v1371_v14 }
 0x2b2   : > { %v1261_v57 = vadd.f32 %v1260_v40, %v1148_v45 }
 0x2b3   : > { %1527 = vst [vmem:[%s2576_s28 + $0xd0] sm:$0xff] %v1484_v31 }
 0x2b6   : > { %v1373_v62 = vpop.f32.mrf.mxu2  ;;  %v1486_v22 = vpop.f32.mrf.mxu3 }
 0x2b7   : > { %v1374_v51 = vadd.f32 %v1373_v62, %v1261_v57  ;;  %v1150_v16 = vpop.f32.mrf.mxu0  ;;  %v1263_v19 = vpop.f32.mrf.mxu1 }
 0x2b8   : > { %v1151_v48 = vadd.f32 %v2558_v9, %v1150_v16 }
 0x2b9   : > { %v1487_v5 = vadd.f32 %v1486_v22, %v1374_v51 }
 0x2ba   : > { %v1264_v0 = vadd.f32 %v1263_v19, %v1151_v48 }
 0x2bb   : > { %1528 = vst [vmem:[%s2576_s28 + $0xd8] sm:$0xff] %v1487_v5 }
 0x2be   : > { %v1376_v21 = vpop.f32.mrf.mxu2  ;;  %v1489_v8 = vpop.f32.mrf.mxu3 }
 0x2bf   : > { %v1377_v25 = vadd.f32 %v1376_v21, %v1264_v0  ;;  %v1153_v41 = vpop.f32.mrf.mxu0  ;;  %v1266_v26 = vpop.f32.mrf.mxu1 }
 0x2c0   : > { %v1154_v43 = vadd.f32 %v2558_v9, %v1153_v41 }
 0x2c1   : > { %v1490_v20 = vadd.f32 %v1489_v8, %v1377_v25 }
 0x2c2   : > { %v1267_v46 = vadd.f32 %v1266_v26, %v1154_v43 }
 0x2c3   : > { %1529 = vst [vmem:[%s2576_s28 + $0xe0] sm:$0xff] %v1490_v20 }
 0x2c6   : > { %v1379_v44 = vpop.f32.mrf.mxu2  ;;  %v1492_v56 = vpop.f32.mrf.mxu3 }
 0x2c7   : > { %v1380_v7 = vadd.f32 %v1379_v44, %v1267_v46  ;;  %v1156_v12 = vpop.f32.mrf.mxu0  ;;  %v1269_v37 = vpop.f32.mrf.mxu1 }
 0x2c8   : > { %v1157_v30 = vadd.f32 %v2558_v9, %v1156_v12 }
 0x2c9   : > { %v1493_v17 = vadd.f32 %v1492_v56, %v1380_v7 }
 0x2ca   : > { %v1270_v58 = vadd.f32 %v1269_v37, %v1157_v30 }
 0x2cb   : > { %1530 = vst [vmem:[%s2576_s28 + $0xe8] sm:$0xff] %v1493_v17 }
 0x2ce   : > { %v1382_v3 = vpop.f32.mrf.mxu2  ;;  %v1495_v2 = vpop.f32.mrf.mxu3 }
 0x2cf   : > { %v1383_v61 = vadd.f32 %v1382_v3, %v1270_v58  ;;  %v1159_v42 = vpop.f32.mrf.mxu0  ;;  %v1272_v11 = vpop.f32.mrf.mxu1 }
 0x2d0   : > { %v1160_v52 = vadd.f32 %v2558_v9, %v1159_v42 }
 0x2d1   : > { %v1496_v10 = vadd.f32 %v1495_v2, %v1383_v61 }
 0x2d2   : > { %v1273_v47 = vadd.f32 %v1272_v11, %v1160_v52 }
 0x2d3   : > { %1531 = vst [vmem:[%s2576_s28 + $0xf0] sm:$0xff] %v1496_v10 }
 0x2d6   : > { %v1385_v27 = vpop.f32.mrf.mxu2  ;;  %v1498_v49 = vpop.f32.mrf.mxu3 }
 0x2d7   : > { %v1386_v28 = vadd.f32 %v1385_v27, %v1273_v47 }
 0x2d9   : > { %v1499_v54 = vadd.f32 %v1498_v49, %v1386_v28 }
 0x2db   : > { %1532 = vst [vmem:[%s2576_s28 + $0xf8] sm:$0xff] %v1499_v54 }
 0x2dc   : > { %1904 = shalt.err (!%p1901_p10)
}
 0x2dd   : > { %s1960_s17 = smov 128   ;;  %s1961_s29 = smov 8  }
 0x2de   : > { %1687 = dma.vmem_to_hbm [thread:$0]  (%p2077_p3), %s1547_s13, 4096, %s1549_s12, %s1534_s22, %s1960_s17, %s1960_s17, %s1961_s29  }
 0x2df PF: > { %s1563_s28 = sand.u32 1, %s1939_s18   ;;  %p2862_p12 = scmp.ge.s32.totalorder %s1951_s21, 2 }
 0x2e0   : > { %s1564_s16 = scalar_lea.sflag [#allocation4], %s1563_s28 }
 0x2e1   : > { %p1704_p13 = pnand %p2862_p12, %p2027_p6 }
 0x2e3   : > { %p1705_p0 = pneg %p1704_p13 }
 0x2e5   : > { %1934 = dma.done.wait (%p1705_p0), %s1564_s16, 4096  }
 0x2e6   : > { %1936 = vsyncadd (%p1705_p0), %s1564_s16, 4294963200  ;;  %p20_p5 = scmp.ge.s32.totalorder %s2064_s30, 4   ;;  %s2863_s18 = smov %s1943_s19 }
 0x2e7   : > { %s2864_s19 = smov %s1947_s20  ;;  %s2865_s20 = smov %s2073_s9 }
 0x2e8   : > { %s2866_s21 = smov %s2064_s30  ;;  %22 = sbr.rel (!%p20_p5) target bundleno = 7 (0x7), region = 97 }
 0x2ed   :  { %1570 = vsyncpa [#allocation3], 1 }
 0x2ee   :  { %1572 = vsyncpa [#allocation3 + $0x1], 1 }
 0x2ef   :  { %1573 = vsyncpa [#allocation6], 1 }
 0x2f0   :  { %1574 = vsyncpa [#allocation9], 1 }
 0x2f1   :  { %1575 = vsyncpa [#allocation4], 1 }
 0x2f2   :  { %1577 = vsyncpa [#allocation4 + $0x1], 1 }

</bundles_post_ra>
